<compile_context>
chip_gen: v5e
topology: v5e:2x2
jax: 0.10.0
libtpu: 0.0.40
codegen_flags: <defaults>
</compile_context>

<pallas_src>
import functools

import numpy as np
import jax
import jax.numpy as jnp
from jax import lax
from jax.experimental import pallas as pl
from jax.experimental.pallas import tpu as pltpu


# ----------------------------- geometry helpers ---------------------------- #

def get_layer_output_size(h, w, k, s=1, p=0, d=1):
    h_out = (h + 2 * p - d * (k - 1) - 1) // s + 1
    w_out = (w + 2 * p - d * (k - 1) - 1) // s + 1
    return h_out, w_out


def get_max_conv_depth(h, w, k_init, k_conv, pool_k):
    h, w = get_layer_output_size(h, w, k_init)
    depth = 1
    while True:
        h2, w2 = get_layer_output_size(h, w, pool_k)
        h2, w2 = get_layer_output_size(h2, w2, k_conv)
        if h2 <= 0 or w2 <= 0:
            break
        h, w = h2, w2
        depth += 1
    return depth


def _round_up(x, m):
    return ((x + m - 1) // m) * m


# ------------------------- parameter preprocessing -------------------------- #

def _toeplitz_conv_weight(w_hwio, w_in):
    """Lower a valid, stride-1 conv to one im2row matmul weight.

    Returns T of shape (KH, w_in*Cin, w_out*Cout) with
        T[kh, wi*Cin + ci, wo*Cout + co] = w[kh, wi - wo, ci, co]  (0 <= wi-wo < KW)
    so that with band[(b,ho), kh*W*Cin + wi*Cin + ci] = x[b, ho+kh, wi, ci]:
        out[(b,ho), wo*Cout+co] = (band @ T.reshape(KH*W*Cin, Wo*Cout))[...]
    """
    KH, KW, Cin, Cout = w_hwio.shape
    w_out = w_in - KW + 1
    t = np.zeros((KH, w_in * Cin, w_out * Cout), np.float32)
    for kh in range(KH):
        for wo in range(w_out):
            for kw in range(KW):
                wi = wo + kw
                t[kh, wi * Cin:(wi + 1) * Cin,
                  wo * Cout:(wo + 1) * Cout] = w_hwio[kh, kw]
    return t


def build_locator_params(key, c_in, h_in, w_in, conv_depth, dense_depth,
                         c_out_factor=2, conv_init_kernel_size=5,
                         conv_kernel_size=3, pool_kernel_size=3, bn_eps=1e-5):
    """Build random eval-mode parameters and pre-pack them for the fused kernel.

    Returns (plan, tensors, raw):
      plan    static python structure describing the layer sequence / shapes
      tensors flat list of kernel-ready device arrays
      raw     untransformed parameters (used by the pure-JAX reference check)
    """
    keys = iter(jax.random.split(key, 256))

    max_depth = get_max_conv_depth(h_in, w_in, conv_init_kernel_size,
                                   conv_kernel_size, pool_kernel_size)
    conv_depth = min(conv_depth, max_depth)

    stages, tensors, raw_conv = [], [], []

    def add_conv(cin, cout, k, h, w):
        h_out, w_out = h - k + 1, w - k + 1
        w_hwio = jax.random.normal(next(keys), (k, k, cin, cout), jnp.float32) * 0.1
        b = jax.random.normal(next(keys), (cout,), jnp.float32) * 0.1
        gamma = 1.0 + 0.1 * jax.random.normal(next(keys), (cout,), jnp.float32)
        beta = 0.1 * jax.random.normal(next(keys), (cout,), jnp.float32)
        running_mean = jnp.zeros((cout,), jnp.float32)   # eval-mode running stats
        running_var = jnp.ones((cout,), jnp.float32)
        inv_std = gamma / jnp.sqrt(running_var + bn_eps)   # BN scale (post-ReLU)
        shift = beta - running_mean * inv_std              # BN shift
        raw_conv.append(("conv", dict(w=w_hwio, b=b, scale=inv_std, shift=shift)))

        # Kernel-ready forms (exact, static host-side reparameterisation).
        t = _toeplitz_conv_weight(np.asarray(w_hwio), w)     # (KH, W*Cin, Wo*Cout)
        tensors.append(jnp.asarray(t.reshape(k * w * cin, w_out * cout)))
        tensors.append(jnp.asarray(np.tile(np.asarray(b), w_out)[None, :]))
        tensors.append(jnp.asarray(np.tile(np.asarray(inv_std), w_out)[None, :]))
        tensors.append(jnp.asarray(np.tile(np.asarray(shift), w_out)[None, :]))
        stages.append(("conv", k, h, h_out, w * cin, w_out * cout))
        return h_out, w_out

    def add_pool(c, k, h, w):
        h_out, w_out = h - k + 1, w - k + 1
        raw_conv.append(("pool", k))
        stages.append(("pool", k, c, h, h_out, w * c, w_out * c))
        return h_out, w_out

    h, w = h_in, w_in
    c_cur = c_in
    c_next = c_cur * c_out_factor
    h, w = add_conv(c_cur, c_next, conv_init_kernel_size, h, w)
    c_cur, c_next = c_next, c_next * c_out_factor
    for _ in range(conv_depth - 1):
        h, w = add_pool(c_cur, pool_kernel_size, h, w)
        h, w = add_conv(c_cur, c_next, conv_kernel_size, h, w)
        c_cur, c_next = c_next, c_next * c_out_factor

    # Dense size schedule, identical to the PyTorch module.
    n_inputs = c_cur * h * w
    n_outputs = 2
    factor = np.log(n_inputs) / np.log(n_outputs)
    sizes = 2 ** np.linspace(1.0, factor, dense_depth + 1)
    sizes = sizes[::-1].copy()
    sizes[0] = n_inputs
    sizes[-1] = n_outputs
    sizes = [int(s) for s in sizes]

    raw_dense = []

    # Dense 0: NCHW Flatten folded into a row-permuted, pre-flattened weight
    # (H*W*C, Dpad).  Hidden (and final) widths are zero-padded to multiples of
    # 128 lanes; padding is exact (pad bias = 0, next layer's padded rows = 0).
    d0_out = sizes[1]
    d0_relu = dense_depth > 1
    W0 = jax.random.normal(next(keys), (n_inputs, d0_out), jnp.float32) / np.sqrt(n_inputs)
    b0 = jax.random.normal(next(keys), (d0_out,), jnp.float32) * 0.1
    raw_dense.append((W0, b0, d0_relu))
    d0_pad = _round_up(d0_out, 128)
    # flatten index f = co*(h*w) + ho*w + wo  ->  row ho*(w*C) + wo*C + co
    W0_perm = (np.asarray(W0).reshape(c_cur, h, w, d0_out)
               .transpose(1, 2, 0, 3)
               .reshape(h * w * c_cur, d0_out))
    W0_packed = np.zeros((h * w * c_cur, d0_pad), np.float32)
    W0_packed[:, :d0_out] = W0_perm
    b0_row = np.zeros((1, d0_pad), np.float32)
    b0_row[0, :d0_out] = np.asarray(b0)
    tensors.append(jnp.asarray(W0_packed))
    tensors.append(jnp.asarray(b0_row))

    dense_rest = []
    in_dim, in_pad = d0_out, d0_pad
    final_pad = d0_pad
    for i in range(1, dense_depth):
        dout = sizes[i + 1]
        is_last = (i == dense_depth - 1)
        Wi = jax.random.normal(next(keys), (in_dim, dout), jnp.float32) / np.sqrt(in_dim)
        bi = jax.random.normal(next(keys), (dout,), jnp.float32) * 0.1
        raw_dense.append((Wi, bi, not is_last))
        o_pad = _round_up(dout, 128)        # last layer is lane-dense padded too
        W_packed = np.zeros((in_pad, o_pad), np.float32)
        W_packed[:in_dim, :dout] = np.asarray(Wi)
        b_row = np.zeros((1, o_pad), np.float32)
        b_row[0, :dout] = np.asarray(bi)
        tensors.append(jnp.asarray(W_packed))
        tensors.append(jnp.asarray(b_row))
        dense_rest.append(not is_last)
        in_dim, in_pad = dout, o_pad
        final_pad = o_pad

    plan = dict(conv=tuple(stages),
                dense0_shape=(h, w * c_cur, d0_pad),   # (Hf, W*C, Dpad)
                dense0_relu=d0_relu,
                dense_rest=tuple(dense_rest),
                out_dim=sizes[-1],
                out_pad=final_pad)
    raw = dict(conv=tuple(raw_conv), dense=tuple(raw_dense))
    return plan, tensors, raw


# ------------------------------ fused kernel -------------------------------- #

def locator_kernel(*refs, plan, block_b):
    """Whole forward pass for a block of `block_b` samples (one grid step)."""
    conv_stages = plan["conv"]
    n_conv_params = 4 * sum(1 for s in conv_stages if s[0] == "conv")
    n_dense_params = 2 * (1 + len(plan["dense_rest"]))
    n_params = n_conv_params + n_dense_params

    x_ref = refs[0]
    params = refs[1:1 + n_params]
    o_ref = refs[1 + n_params]
    scratch = refs[2 + n_params:]

    B = block_b

    def read_rows(ref, is_input, r0, nrows):
        # Static per-sample row-band slice of the current activation.
        if is_input:
            return ref[0, r0:r0 + nrows, :]
        return ref[r0:r0 + nrows, :]

    src_ref, src_is_input = x_ref, True    # no staging copy: read x directly
    p = 0
    sc = 0
    for stage in conv_stages:
        if stage[0] == "conv":
            _, k, h_in, h_out, wc_in, wc_out = stage
            band_ref = scratch[sc]          # (B*Ho, KH*W*Cin)  im2row buffer
            act_ref = scratch[sc + 1]       # (B*Ho, Wo*Cout)   stage output
            sc += 2
            t_ref, b_ref, s_ref, sh_ref = params[p:p + 4]
            p += 4
            # im2row: band[(b,ho), kh*WCin + j] = src[b, ho+kh, j]
            for b in range(B):
                for kh in range(k):
                    band_ref[b * h_out:(b + 1) * h_out,
                             kh * wc_in:(kh + 1) * wc_in] = read_rows(
                                 src_ref, src_is_input, b * h_in + kh, h_out)
            # ONE batched MXU matmul per conv: (B*Ho, KH*WCin) @ (KH*WCin, Wo*Cout)
            acc = jnp.dot(band_ref[...], t_ref[...],
                          preferred_element_type=jnp.float32) + b_ref[...]
            # Module order is Conv2d -> activation -> BatchNorm2d -> Dropout2d,
            # so ReLU comes before the BN affine (eval running stats folded).
            # TODO(synk): Dropout2d is identity in eval mode; omitted.
            act_ref[...] = jnp.maximum(acc, 0.0) * s_ref[...] + sh_ref[...]
            src_ref, src_is_input = act_ref, False
        else:
            # ("pool", k, C, Hin, Hout, W*C in, Wout*C): separable stride-1 max pool.
            _, k, c, h_in, h_out, wc_in, wc_out = stage
            tmp_ref = scratch[sc]           # (B*Ho, Win*C)  dh-maxed rows
            dst_ref = scratch[sc + 1]       # (B*Ho, Wout*C) pooled output
            sc += 2
            # Pass 1: max over row offsets dh (per sample row bands).
            for b in range(B):
                rowmax = read_rows(src_ref, src_is_input, b * h_in, h_out)
                for dh in range(1, k):
                    rowmax = jnp.maximum(
                        rowmax,
                        read_rows(src_ref, src_is_input, b * h_in + dh, h_out))
                tmp_ref[b * h_out:(b + 1) * h_out, :] = rowmax
            # Pass 2: max over column offsets dw (lane shifts, whole batch at once).
            colmax = tmp_ref[:, 0:wc_out]
            for dw in range(1, k):
                colmax = jnp.maximum(colmax, tmp_ref[:, dw * c:dw * c + wc_out])
            dst_ref[...] = colmax
            src_ref, src_is_input = dst_ref, False

    # ---- dense stack: Flatten folded into the pre-permuted dense-0 weight ---- #
    hf, wcf, _ = plan["dense0_shape"]
    flat_ref = scratch[sc]                  # (B, Hf*W*C) flat feature
    # TODO(synk): these per-(sample,row) copies could become Hf strided sublane
    # loads (ref[pl.ds(r, B, stride=hf), :]) to cut the copy count for large B.
    for b in range(B):
        for r in range(hf):
            flat_ref[b:b + 1, r * wcf:(r + 1) * wcf] = \
                src_ref[b * hf + r:b * hf + r + 1, :]

    w0_ref, b0_ref = params[p], params[p + 1]
    p += 2
    # ONE matmul for dense-0: (B, Hf*W*C) @ (Hf*W*C, Dpad).
    z = jnp.dot(flat_ref[...], w0_ref[...],
                preferred_element_type=jnp.float32) + b0_ref[...]
    if plan["dense0_relu"]:
        z = jnp.maximum(z, 0.0)
    for relu in plan["dense_rest"]:
        w_ref, b_ref = params[p], params[p + 1]
        p += 2
        z = jnp.dot(z, w_ref[...], preferred_element_type=jnp.float32) + b_ref[...]
        if relu:
            z = jnp.maximum(z, 0.0)
    o_ref[0] = z.astype(o_ref.dtype)        # lane-dense (B, 128) store


def locator_forward(x_nchw, plan, tensors, block_b=None):
    N, C, H, W = x_nchw.shape
    if block_b is None:
        # Largest batch block <= 8 that divides N (single step for the demo;
        # multiple "parallel" steps let v7x's two TensorCores split the batch).
        block_b = max(d for d in range(1, min(N, 8) + 1) if N % d == 0)
    assert N % block_b == 0, "batch must be divisible by block_b"
    num_blocks = N // block_b

    # NCHW -> lane-dense (num_blocks, B*H, W*C) once at the boundary.
    x = jnp.transpose(x_nchw, (0, 2, 3, 1)).reshape(num_blocks, block_b * H, W * C)

    out_dim = plan["out_dim"]
    out_pad = plan["out_pad"]

    def const_spec(shape):
        nd = len(shape)
        return pl.BlockSpec(shape, lambda n: (0,) * nd)

    in_specs = [pl.BlockSpec((1, block_b * H, W * C), lambda n: (n, 0, 0))]
    in_specs += [const_spec(t.shape) for t in tensors]
    out_specs = pl.BlockSpec((1, block_b, out_pad), lambda n: (n, 0, 0))

    scratch_shapes = []
    for st in plan["conv"]:
        if st[0] == "conv":
            _, k, _h_in, h_out, wc_in, wc_out = st
            scratch_shapes.append(pltpu.VMEM((block_b * h_out, k * wc_in), jnp.float32))
            scratch_shapes.append(pltpu.VMEM((block_b * h_out, wc_out), jnp.float32))
        else:
            _, k, c, _h_in, h_out, wc_in, wc_out = st
            scratch_shapes.append(pltpu.VMEM((block_b * h_out, wc_in), jnp.float32))
            scratch_shapes.append(pltpu.VMEM((block_b * h_out, wc_out), jnp.float32))
    hf, wcf, _ = plan["dense0_shape"]
    scratch_shapes.append(pltpu.VMEM((block_b, hf * wcf), jnp.float32))

    out = pl.pallas_call(
        functools.partial(locator_kernel, plan=plan, block_b=block_b),
        grid=(num_blocks,),
        in_specs=in_specs,
        out_specs=out_specs,
        out_shape=jax.ShapeDtypeStruct((num_blocks, block_b, out_pad), jnp.float32),
        scratch_shapes=scratch_shapes,
        compiler_params=pltpu.CompilerParams(
            dimension_semantics=("parallel",),          # 2 TCs on v7x split blocks
            vmem_limit_bytes=32 * 1024 * 1024),
    )(x, *tensors)
    # Lane-dense (128-wide) output store in-kernel; the cheap slice to the real
    # 2-wide result happens here in XLA.
    return out.reshape(N, out_pad)[:, :out_dim]


# ---------------------------- pure-JAX reference ---------------------------- #

def reference_forward(x_nchw, raw):
    x = jnp.transpose(x_nchw, (0, 2, 3, 1)).astype(jnp.float32)   # NHWC
    for kind, p in raw["conv"]:
        if kind == "pool":
            x = lax.reduce_window(x, -jnp.inf, lax.max,
                                  (1, p, p, 1), (1, 1, 1, 1), "VALID")
        else:
            y = lax.conv_general_dilated(
                x, p["w"], window_strides=(1, 1), padding="VALID",
                dimension_numbers=("NHWC", "HWIO", "NHWC"),
                precision=lax.Precision.HIGHEST)
            y = jnp.maximum(y + p["b"].reshape(1, 1, 1, -1), 0.0)
            x = y * p["scale"].reshape(1, 1, 1, -1) + p["shift"].reshape(1, 1, 1, -1)
    x = jnp.transpose(x, (0, 3, 1, 2)).reshape(x.shape[0], -1)    # NCHW flatten
    for w_d, b_d, relu in raw["dense"]:
        x = jnp.dot(x, w_d, precision=lax.Precision.HIGHEST) + b_d.reshape(1, -1)
        if relu:
            x = jnp.maximum(x, 0.0)
    return x


# ---------------------------------- main ------------------------------------ #

if __name__ == "__main__":
    batch, c_in, h_in, w_in = 2, 4, 16, 16
    conv_depth, dense_depth = 2, 2

    key = jax.random.PRNGKey(0)
    k_x, k_p = jax.random.split(key)
    x = jax.random.normal(k_x, (batch, c_in, h_in, w_in), jnp.float32)

    plan, tensors, raw = build_locator_params(
        k_p, c_in, h_in, w_in, conv_depth, dense_depth)

    locations = locator_forward(x, plan, tensors)
    locations = jax.block_until_ready(locations)

    assert locations.shape == (batch, 2), locations.shape
    assert locations.dtype == jnp.float32
    assert bool(jnp.all(jnp.isfinite(locations)))

    # Cross-check the fused kernel against a plain XLA implementation.
    # All-f32 pipeline (MXU multi-pass f32 matmuls) -> tight tolerance.
    ref = reference_forward(x, raw)
    max_err = float(jnp.max(jnp.abs(locations - ref)))
    assert bool(jnp.allclose(locations, ref, rtol=1e-3, atol=1e-3)), max_err

    print("KERNEL_OK")
</pallas_src>

<mosaic_0001>
module attributes {stable_mosaic.version = 11 : i64} {
  func.func @locator_kernel(%arg0: i32, %arg1: memref<1x32x64xf32, #tpu.memory_space<vmem>>, %arg2: memref<320x96xf32, #tpu.memory_space<vmem>>, %arg3: memref<1x96xf32, #tpu.memory_space<vmem>>, %arg4: memref<1x96xf32, #tpu.memory_space<vmem>>, %arg5: memref<1x96xf32, #tpu.memory_space<vmem>>, %arg6: memref<240x128xf32, #tpu.memory_space<vmem>>, %arg7: memref<1x128xf32, #tpu.memory_space<vmem>>, %arg8: memref<1x128xf32, #tpu.memory_space<vmem>>, %arg9: memref<1x128xf32, #tpu.memory_space<vmem>>, %arg10: memref<1024x128xf32, #tpu.memory_space<vmem>>, %arg11: memref<1x128xf32, #tpu.memory_space<vmem>>, %arg12: memref<128x128xf32, #tpu.memory_space<vmem>>, %arg13: memref<1x128xf32, #tpu.memory_space<vmem>>, %arg14: memref<1x2x128xf32, #tpu.memory_space<vmem>>, %arg15: memref<24x320xf32, #tpu.memory_space<vmem>>, %arg16: memref<24x96xf32, #tpu.memory_space<vmem>>, %arg17: memref<20x96xf32, #tpu.memory_space<vmem>>, %arg18: memref<20x80xf32, #tpu.memory_space<vmem>>, %arg19: memref<16x240xf32, #tpu.memory_space<vmem>>, %arg20: memref<16x128xf32, #tpu.memory_space<vmem>>, %arg21: memref<2x1024xf32, #tpu.memory_space<vmem>>) attributes {dimension_semantics = [#tpu.dimension_semantics<parallel>], iteration_bounds = array<i64: 1>, scalar_prefetch = 0 : i64, scratch_operands = 7 : i64, tpu.core_type = #tpu.core_type<tc>, window_params = [{transform_indices = @transform_0, window_bounds = array<i64: 1, 32, 64>}, {pipeline_mode = #tpu.pipeline_mode<synchronous>, transform_indices = @transform_1, window_bounds = array<i64: 320, 96>}, {pipeline_mode = #tpu.pipeline_mode<synchronous>, transform_indices = @transform_2, window_bounds = array<i64: 1, 96>}, {pipeline_mode = #tpu.pipeline_mode<synchronous>, transform_indices = @transform_3, window_bounds = array<i64: 1, 96>}, {pipeline_mode = #tpu.pipeline_mode<synchronous>, transform_indices = @transform_4, window_bounds = array<i64: 1, 96>}, {pipeline_mode = #tpu.pipeline_mode<synchronous>, transform_indices = @transform_5, window_bounds = array<i64: 240, 128>}, {pipeline_mode = #tpu.pipeline_mode<synchronous>, transform_indices = @transform_6, window_bounds = array<i64: 1, 128>}, {pipeline_mode = #tpu.pipeline_mode<synchronous>, transform_indices = @transform_7, window_bounds = array<i64: 1, 128>}, {pipeline_mode = #tpu.pipeline_mode<synchronous>, transform_indices = @transform_8, window_bounds = array<i64: 1, 128>}, {pipeline_mode = #tpu.pipeline_mode<synchronous>, transform_indices = @transform_9, window_bounds = array<i64: 1024, 128>}, {pipeline_mode = #tpu.pipeline_mode<synchronous>, transform_indices = @transform_10, window_bounds = array<i64: 1, 128>}, {pipeline_mode = #tpu.pipeline_mode<synchronous>, transform_indices = @transform_11, window_bounds = array<i64: 128, 128>}, {pipeline_mode = #tpu.pipeline_mode<synchronous>, transform_indices = @transform_12, window_bounds = array<i64: 1, 128>}, {transform_indices = @transform_13, window_bounds = array<i64: 1, 2, 128>}]} {
    %c0 = arith.constant 0 : index
    %c0_0 = arith.constant 0 : index
    %c0_1 = arith.constant 0 : index
    %0 = vector.load %arg1[%c0, %c0_0, %c0_1] : memref<1x32x64xf32, #tpu.memory_space<vmem>>, vector<1x12x64xf32>
    %1 = vector.shape_cast %0 : vector<1x12x64xf32> to vector<12x64xf32>
    %c0_2 = arith.constant 0 : index
    %c0_3 = arith.constant 0 : index
    %2 = vector.load %arg15[%c0_2, %c0_3] : memref<24x320xf32, #tpu.memory_space<vmem>>, vector<12x64xf32>
    tpu.vector_store %arg15[%c0_2, %c0_3], %1 {strides = array<i32>} : memref<24x320xf32, #tpu.memory_space<vmem>>, vector<12x64xf32>,
    %c0_4 = arith.constant 0 : index
    %c1 = arith.constant 1 : index
    %c0_5 = arith.constant 0 : index
    %3 = vector.load %arg1[%c0_4, %c1, %c0_5] : memref<1x32x64xf32, #tpu.memory_space<vmem>>, vector<1x12x64xf32>
    %4 = vector.shape_cast %3 : vector<1x12x64xf32> to vector<12x64xf32>
    %c0_6 = arith.constant 0 : index
    %c64 = arith.constant 64 : index
    %5 = vector.load %arg15[%c0_6, %c64] : memref<24x320xf32, #tpu.memory_space<vmem>>, vector<12x64xf32>
    tpu.vector_store %arg15[%c0_6, %c64], %4 {strides = array<i32>} : memref<24x320xf32, #tpu.memory_space<vmem>>, vector<12x64xf32>,
    %c0_7 = arith.constant 0 : index
    %c2 = arith.constant 2 : index
    %c0_8 = arith.constant 0 : index
    %6 = vector.load %arg1[%c0_7, %c2, %c0_8] : memref<1x32x64xf32, #tpu.memory_space<vmem>>, vector<1x12x64xf32>
    %7 = vector.shape_cast %6 : vector<1x12x64xf32> to vector<12x64xf32>
    %c0_9 = arith.constant 0 : index
    %c128 = arith.constant 128 : index
    %8 = vector.load %arg15[%c0_9, %c128] : memref<24x320xf32, #tpu.memory_space<vmem>>, vector<12x64xf32>
    tpu.vector_store %arg15[%c0_9, %c128], %7 {strides = array<i32>} : memref<24x320xf32, #tpu.memory_space<vmem>>, vector<12x64xf32>,
    %c0_10 = arith.constant 0 : index
    %c3 = arith.constant 3 : index
    %c0_11 = arith.constant 0 : index
    %9 = vector.load %arg1[%c0_10, %c3, %c0_11] : memref<1x32x64xf32, #tpu.memory_space<vmem>>, vector<1x12x64xf32>
    %10 = vector.shape_cast %9 : vector<1x12x64xf32> to vector<12x64xf32>
    %c0_12 = arith.constant 0 : index
    %c192 = arith.constant 192 : index
    %11 = vector.load %arg15[%c0_12, %c192] : memref<24x320xf32, #tpu.memory_space<vmem>>, vector<12x64xf32>
    tpu.vector_store %arg15[%c0_12, %c192], %10 {strides = array<i32>} : memref<24x320xf32, #tpu.memory_space<vmem>>, vector<12x64xf32>,
    %c0_13 = arith.constant 0 : index
    %c4 = arith.constant 4 : index
    %c0_14 = arith.constant 0 : index
    %12 = vector.load %arg1[%c0_13, %c4, %c0_14] : memref<1x32x64xf32, #tpu.memory_space<vmem>>, vector<1x12x64xf32>
    %13 = vector.shape_cast %12 : vector<1x12x64xf32> to vector<12x64xf32>
    %c0_15 = arith.constant 0 : index
    %c256 = arith.constant 256 : index
    %14 = vector.load %arg15[%c0_15, %c256] : memref<24x320xf32, #tpu.memory_space<vmem>>, vector<12x64xf32>
    tpu.vector_store %arg15[%c0_15, %c256], %13 {strides = array<i32>} : memref<24x320xf32, #tpu.memory_space<vmem>>, vector<12x64xf32>,
    %c0_16 = arith.constant 0 : index
    %c16 = arith.constant 16 : index
    %c0_17 = arith.constant 0 : index
    %15 = vector.load %arg1[%c0_16, %c16, %c0_17] : memref<1x32x64xf32, #tpu.memory_space<vmem>>, vector<1x12x64xf32>
    %16 = vector.shape_cast %15 : vector<1x12x64xf32> to vector<12x64xf32>
    %c12 = arith.constant 12 : index
    %c0_18 = arith.constant 0 : index
    %17 = vector.load %arg15[%c12, %c0_18] : memref<24x320xf32, #tpu.memory_space<vmem>>, vector<12x64xf32>
    tpu.vector_store %arg15[%c12, %c0_18], %16 {strides = array<i32>} : memref<24x320xf32, #tpu.memory_space<vmem>>, vector<12x64xf32>,
    %c0_19 = arith.constant 0 : index
    %c17 = arith.constant 17 : index
    %c0_20 = arith.constant 0 : index
    %18 = vector.load %arg1[%c0_19, %c17, %c0_20] : memref<1x32x64xf32, #tpu.memory_space<vmem>>, vector<1x12x64xf32>
    %19 = vector.shape_cast %18 : vector<1x12x64xf32> to vector<12x64xf32>
    %c12_21 = arith.constant 12 : index
    %c64_22 = arith.constant 64 : index
    %20 = vector.load %arg15[%c12_21, %c64_22] : memref<24x320xf32, #tpu.memory_space<vmem>>, vector<12x64xf32>
    tpu.vector_store %arg15[%c12_21, %c64_22], %19 {strides = array<i32>} : memref<24x320xf32, #tpu.memory_space<vmem>>, vector<12x64xf32>,
    %c0_23 = arith.constant 0 : index
    %c18 = arith.constant 18 : index
    %c0_24 = arith.constant 0 : index
    %21 = vector.load %arg1[%c0_23, %c18, %c0_24] : memref<1x32x64xf32, #tpu.memory_space<vmem>>, vector<1x12x64xf32>
    %22 = vector.shape_cast %21 : vector<1x12x64xf32> to vector<12x64xf32>
    %c12_25 = arith.constant 12 : index
    %c128_26 = arith.constant 128 : index
    %23 = vector.load %arg15[%c12_25, %c128_26] : memref<24x320xf32, #tpu.memory_space<vmem>>, vector<12x64xf32>
    tpu.vector_store %arg15[%c12_25, %c128_26], %22 {strides = array<i32>} : memref<24x320xf32, #tpu.memory_space<vmem>>, vector<12x64xf32>,
    %c0_27 = arith.constant 0 : index
    %c19 = arith.constant 19 : index
    %c0_28 = arith.constant 0 : index
    %24 = vector.load %arg1[%c0_27, %c19, %c0_28] : memref<1x32x64xf32, #tpu.memory_space<vmem>>, vector<1x12x64xf32>
    %25 = vector.shape_cast %24 : vector<1x12x64xf32> to vector<12x64xf32>
    %c12_29 = arith.constant 12 : index
    %c192_30 = arith.constant 192 : index
    %26 = vector.load %arg15[%c12_29, %c192_30] : memref<24x320xf32, #tpu.memory_space<vmem>>, vector<12x64xf32>
    tpu.vector_store %arg15[%c12_29, %c192_30], %25 {strides = array<i32>} : memref<24x320xf32, #tpu.memory_space<vmem>>, vector<12x64xf32>,
    %c0_31 = arith.constant 0 : index
    %c20 = arith.constant 20 : index
    %c0_32 = arith.constant 0 : index
    %27 = vector.load %arg1[%c0_31, %c20, %c0_32] : memref<1x32x64xf32, #tpu.memory_space<vmem>>, vector<1x12x64xf32>
    %28 = vector.shape_cast %27 : vector<1x12x64xf32> to vector<12x64xf32>
    %c12_33 = arith.constant 12 : index
    %c256_34 = arith.constant 256 : index
    %29 = vector.load %arg15[%c12_33, %c256_34] : memref<24x320xf32, #tpu.memory_space<vmem>>, vector<12x64xf32>
    tpu.vector_store %arg15[%c12_33, %c256_34], %28 {strides = array<i32>} : memref<24x320xf32, #tpu.memory_space<vmem>>, vector<12x64xf32>,
    %c0_35 = arith.constant 0 : index
    %c0_36 = arith.constant 0 : index
    %30 = vector.load %arg15[%c0_35, %c0_36] : memref<24x320xf32, #tpu.memory_space<vmem>>, vector<24x320xf32>
    %c0_37 = arith.constant 0 : index
    %c0_38 = arith.constant 0 : index
    %31 = vector.load %arg2[%c0_37, %c0_38] : memref<320x96xf32, #tpu.memory_space<vmem>>, vector<320x96xf32>
    %cst = arith.constant dense<0.000000e+00> : vector<24x96xf32>
    %32 = tpu.matmul %30, %31, %cst {dimension_numbers = #tpu.dot_dimension_numbers<[1], [0], [0], [1], [0, 0, 1, 1], [], []>} : vector<24x320xf32>, vector<320x96xf32>, vector<24x96xf32> -> vector<24x96xf32>
    %c0_39 = arith.constant 0 : index
    %c0_40 = arith.constant 0 : index
    %33 = vector.load %arg3[%c0_39, %c0_40] : memref<1x96xf32, #tpu.memory_space<vmem>>, vector<1x96xf32>
    %34 = vector.broadcast %33 : vector<1x96xf32> to vector<24x96xf32>
    %35 = arith.addf %32, %34 : vector<24x96xf32>
    %cst_41 = arith.constant 0.000000e+00 : f32
    %36 = vector.broadcast %cst_41 : f32 to vector<24x96xf32>
    %37 = arith.maximumf %35, %36 : vector<24x96xf32>
    %c0_42 = arith.constant 0 : index
    %c0_43 = arith.constant 0 : index
    %38 = vector.load %arg4[%c0_42, %c0_43] : memref<1x96xf32, #tpu.memory_space<vmem>>, vector<1x96xf32>
    %39 = vector.broadcast %38 : vector<1x96xf32> to vector<24x96xf32>
    %40 = arith.mulf %37, %39 : vector<24x96xf32>
    %c0_44 = arith.constant 0 : index
    %c0_45 = arith.constant 0 : index
    %41 = vector.load %arg5[%c0_44, %c0_45] : memref<1x96xf32, #tpu.memory_space<vmem>>, vector<1x96xf32>
    %42 = vector.broadcast %41 : vector<1x96xf32> to vector<24x96xf32>
    %43 = arith.addf %40, %42 : vector<24x96xf32>
    %c0_46 = arith.constant 0 : index
    %c0_47 = arith.constant 0 : index
    %44 = vector.load %arg16[%c0_46, %c0_47] : memref<24x96xf32, #tpu.memory_space<vmem>>, vector<24x96xf32>
    tpu.vector_store %arg16[%c0_46, %c0_47], %43 {strides = array<i32>} : memref<24x96xf32, #tpu.memory_space<vmem>>, vector<24x96xf32>,
    %c0_48 = arith.constant 0 : index
    %c0_49 = arith.constant 0 : index
    %45 = vector.load %arg16[%c0_48, %c0_49] : memref<24x96xf32, #tpu.memory_space<vmem>>, vector<10x96xf32>
    %c1_50 = arith.constant 1 : index
    %c0_51 = arith.constant 0 : index
    %46 = vector.load %arg16[%c1_50, %c0_51] : memref<24x96xf32, #tpu.memory_space<vmem>>, vector<10x96xf32>
    %47 = arith.maximumf %45, %46 : vector<10x96xf32>
    %c2_52 = arith.constant 2 : index
    %c0_53 = arith.constant 0 : index
    %48 = vector.load %arg16[%c2_52, %c0_53] : memref<24x96xf32, #tpu.memory_space<vmem>>, vector<10x96xf32>
    %49 = arith.maximumf %47, %48 : vector<10x96xf32>
    %c0_54 = arith.constant 0 : index
    %c0_55 = arith.constant 0 : index
    %50 = vector.load %arg17[%c0_54, %c0_55] : memref<20x96xf32, #tpu.memory_space<vmem>>, vector<10x96xf32>
    tpu.vector_store %arg17[%c0_54, %c0_55], %49 {strides = array<i32>} : memref<20x96xf32, #tpu.memory_space<vmem>>, vector<10x96xf32>,
    %c12_56 = arith.constant 12 : index
    %c0_57 = arith.constant 0 : index
    %51 = vector.load %arg16[%c12_56, %c0_57] : memref<24x96xf32, #tpu.memory_space<vmem>>, vector<10x96xf32>
    %c13 = arith.constant 13 : index
    %c0_58 = arith.constant 0 : index
    %52 = vector.load %arg16[%c13, %c0_58] : memref<24x96xf32, #tpu.memory_space<vmem>>, vector<10x96xf32>
    %53 = arith.maximumf %51, %52 : vector<10x96xf32>
    %c14 = arith.constant 14 : index
    %c0_59 = arith.constant 0 : index
    %54 = vector.load %arg16[%c14, %c0_59] : memref<24x96xf32, #tpu.memory_space<vmem>>, vector<10x96xf32>
    %55 = arith.maximumf %53, %54 : vector<10x96xf32>
    %c10 = arith.constant 10 : index
    %c0_60 = arith.constant 0 : index
    %56 = vector.load %arg17[%c10, %c0_60] : memref<20x96xf32, #tpu.memory_space<vmem>>, vector<10x96xf32>
    tpu.vector_store %arg17[%c10, %c0_60], %55 {strides = array<i32>} : memref<20x96xf32, #tpu.memory_space<vmem>>, vector<10x96xf32>,
    %c0_61 = arith.constant 0 : index
    %c0_62 = arith.constant 0 : index
    %57 = vector.load %arg17[%c0_61, %c0_62] : memref<20x96xf32, #tpu.memory_space<vmem>>, vector<20x80xf32>
    %c0_63 = arith.constant 0 : index
    %c8 = arith.constant 8 : index
    %58 = vector.load %arg17[%c0_63, %c8] : memref<20x96xf32, #tpu.memory_space<vmem>>, vector<20x80xf32>
    %59 = arith.maximumf %57, %58 : vector<20x80xf32>
    %c0_64 = arith.constant 0 : index
    %c16_65 = arith.constant 16 : index
    %60 = vector.load %arg17[%c0_64, %c16_65] : memref<20x96xf32, #tpu.memory_space<vmem>>, vector<20x80xf32>
    %61 = arith.maximumf %59, %60 : vector<20x80xf32>
    %c0_66 = arith.constant 0 : index
    %c0_67 = arith.constant 0 : index
    %62 = vector.load %arg18[%c0_66, %c0_67] : memref<20x80xf32, #tpu.memory_space<vmem>>, vector<20x80xf32>
    tpu.vector_store %arg18[%c0_66, %c0_67], %61 {strides = array<i32>} : memref<20x80xf32, #tpu.memory_space<vmem>>, vector<20x80xf32>,
    %c0_68 = arith.constant 0 : index
    %c0_69 = arith.constant 0 : index
    %63 = vector.load %arg18[%c0_68, %c0_69] : memref<20x80xf32, #tpu.memory_space<vmem>>, vector<8x80xf32>
    %c0_70 = arith.constant 0 : index
    %c0_71 = arith.constant 0 : index
    %64 = vector.load %arg19[%c0_70, %c0_71] : memref<16x240xf32, #tpu.memory_space<vmem>>, vector<8x80xf32>
    tpu.vector_store %arg19[%c0_70, %c0_71], %63 {strides = array<i32>} : memref<16x240xf32, #tpu.memory_space<vmem>>, vector<8x80xf32>,
    %c1_72 = arith.constant 1 : index
    %c0_73 = arith.constant 0 : index
    %65 = vector.load %arg18[%c1_72, %c0_73] : memref<20x80xf32, #tpu.memory_space<vmem>>, vector<8x80xf32>
    %c0_74 = arith.constant 0 : index
    %c80 = arith.constant 80 : index
    %66 = vector.load %arg19[%c0_74, %c80] : memref<16x240xf32, #tpu.memory_space<vmem>>, vector<8x80xf32>
    tpu.vector_store %arg19[%c0_74, %c80], %65 {strides = array<i32>} : memref<16x240xf32, #tpu.memory_space<vmem>>, vector<8x80xf32>,
    %c2_75 = arith.constant 2 : index
    %c0_76 = arith.constant 0 : index
    %67 = vector.load %arg18[%c2_75, %c0_76] : memref<20x80xf32, #tpu.memory_space<vmem>>, vector<8x80xf32>
    %c0_77 = arith.constant 0 : index
    %c160 = arith.constant 160 : index
    %68 = vector.load %arg19[%c0_77, %c160] : memref<16x240xf32, #tpu.memory_space<vmem>>, vector<8x80xf32>
    tpu.vector_store %arg19[%c0_77, %c160], %67 {strides = array<i32>} : memref<16x240xf32, #tpu.memory_space<vmem>>, vector<8x80xf32>,
    %c10_78 = arith.constant 10 : index
    %c0_79 = arith.constant 0 : index
    %69 = vector.load %arg18[%c10_78, %c0_79] : memref<20x80xf32, #tpu.memory_space<vmem>>, vector<8x80xf32>
    %c8_80 = arith.constant 8 : index
    %c0_81 = arith.constant 0 : index
    %70 = vector.load %arg19[%c8_80, %c0_81] : memref<16x240xf32, #tpu.memory_space<vmem>>, vector<8x80xf32>
    tpu.vector_store %arg19[%c8_80, %c0_81], %69 {strides = array<i32>} : memref<16x240xf32, #tpu.memory_space<vmem>>, vector<8x80xf32>,
    %c11 = arith.constant 11 : index
    %c0_82 = arith.constant 0 : index
    %71 = vector.load %arg18[%c11, %c0_82] : memref<20x80xf32, #tpu.memory_space<vmem>>, vector<8x80xf32>
    %c8_83 = arith.constant 8 : index
    %c80_84 = arith.constant 80 : index
    %72 = vector.load %arg19[%c8_83, %c80_84] : memref<16x240xf32, #tpu.memory_space<vmem>>, vector<8x80xf32>
    tpu.vector_store %arg19[%c8_83, %c80_84], %71 {strides = array<i32>} : memref<16x240xf32, #tpu.memory_space<vmem>>, vector<8x80xf32>,
    %c12_85 = arith.constant 12 : index
    %c0_86 = arith.constant 0 : index
    %73 = vector.load %arg18[%c12_85, %c0_86] : memref<20x80xf32, #tpu.memory_space<vmem>>, vector<8x80xf32>
    %c8_87 = arith.constant 8 : index
    %c160_88 = arith.constant 160 : index
    %74 = vector.load %arg19[%c8_87, %c160_88] : memref<16x240xf32, #tpu.memory_space<vmem>>, vector<8x80xf32>
    tpu.vector_store %arg19[%c8_87, %c160_88], %73 {strides = array<i32>} : memref<16x240xf32, #tpu.memory_space<vmem>>, vector<8x80xf32>,
    %c0_89 = arith.constant 0 : index
    %c0_90 = arith.constant 0 : index
    %75 = vector.load %arg19[%c0_89, %c0_90] : memref<16x240xf32, #tpu.memory_space<vmem>>, vector<16x240xf32>
    %c0_91 = arith.constant 0 : index
    %c0_92 = arith.constant 0 : index
    %76 = vector.load %arg6[%c0_91, %c0_92] : memref<240x128xf32, #tpu.memory_space<vmem>>, vector<240x128xf32>
    %cst_93 = arith.constant dense<0.000000e+00> : vector<16x128xf32>
    %77 = tpu.matmul %75, %76, %cst_93 {dimension_numbers = #tpu.dot_dimension_numbers<[1], [0], [0], [1], [0, 0, 1, 1], [], []>} : vector<16x240xf32>, vector<240x128xf32>, vector<16x128xf32> -> vector<16x128xf32>
    %c0_94 = arith.constant 0 : index
    %c0_95 = arith.constant 0 : index
    %78 = vector.load %arg7[%c0_94, %c0_95] : memref<1x128xf32, #tpu.memory_space<vmem>>, vector<1x128xf32>
    %79 = vector.broadcast %78 : vector<1x128xf32> to vector<16x128xf32>
    %80 = arith.addf %77, %79 : vector<16x128xf32>
    %cst_96 = arith.constant 0.000000e+00 : f32
    %81 = vector.broadcast %cst_96 : f32 to vector<16x128xf32>
    %82 = arith.maximumf %80, %81 : vector<16x128xf32>
    %c0_97 = arith.constant 0 : index
    %c0_98 = arith.constant 0 : index
    %83 = vector.load %arg8[%c0_97, %c0_98] : memref<1x128xf32, #tpu.memory_space<vmem>>, vector<1x128xf32>
    %84 = vector.broadcast %83 : vector<1x128xf32> to vector<16x128xf32>
    %85 = arith.mulf %82, %84 : vector<16x128xf32>
    %c0_99 = arith.constant 0 : index
    %c0_100 = arith.constant 0 : index
    %86 = vector.load %arg9[%c0_99, %c0_100] : memref<1x128xf32, #tpu.memory_space<vmem>>, vector<1x128xf32>
    %87 = vector.broadcast %86 : vector<1x128xf32> to vector<16x128xf32>
    %88 = arith.addf %85, %87 : vector<16x128xf32>
    %c0_101 = arith.constant 0 : index
    %c0_102 = arith.constant 0 : index
    %89 = vector.load %arg20[%c0_101, %c0_102] : memref<16x128xf32, #tpu.memory_space<vmem>>, vector<16x128xf32>
    tpu.vector_store %arg20[%c0_101, %c0_102], %88 {strides = array<i32>} : memref<16x128xf32, #tpu.memory_space<vmem>>, vector<16x128xf32>,
    %c0_103 = arith.constant 0 : index
    %c0_104 = arith.constant 0 : index
    %90 = vector.load %arg20[%c0_103, %c0_104] : memref<16x128xf32, #tpu.memory_space<vmem>>, vector<1x128xf32>
    %c0_105 = arith.constant 0 : index
    %c0_106 = arith.constant 0 : index
    %91 = vector.load %arg21[%c0_105, %c0_106] : memref<2x1024xf32, #tpu.memory_space<vmem>>, vector<1x128xf32>
    tpu.vector_store %arg21[%c0_105, %c0_106], %90 {strides = array<i32>} : memref<2x1024xf32, #tpu.memory_space<vmem>>, vector<1x128xf32>,
    %c1_107 = arith.constant 1 : index
    %c0_108 = arith.constant 0 : index
    %92 = vector.load %arg20[%c1_107, %c0_108] : memref<16x128xf32, #tpu.memory_space<vmem>>, vector<1x128xf32>
    %c0_109 = arith.constant 0 : index
    %c128_110 = arith.constant 128 : index
    %93 = vector.load %arg21[%c0_109, %c128_110] : memref<2x1024xf32, #tpu.memory_space<vmem>>, vector<1x128xf32>
    tpu.vector_store %arg21[%c0_109, %c128_110], %92 {strides = array<i32>} : memref<2x1024xf32, #tpu.memory_space<vmem>>, vector<1x128xf32>,
    %c2_111 = arith.constant 2 : index
    %c0_112 = arith.constant 0 : index
    %94 = vector.load %arg20[%c2_111, %c0_112] : memref<16x128xf32, #tpu.memory_space<vmem>>, vector<1x128xf32>
    %c0_113 = arith.constant 0 : index
    %c256_114 = arith.constant 256 : index
    %95 = vector.load %arg21[%c0_113, %c256_114] : memref<2x1024xf32, #tpu.memory_space<vmem>>, vector<1x128xf32>
    tpu.vector_store %arg21[%c0_113, %c256_114], %94 {strides = array<i32>} : memref<2x1024xf32, #tpu.memory_space<vmem>>, vector<1x128xf32>,
    %c3_115 = arith.constant 3 : index
    %c0_116 = arith.constant 0 : index
    %96 = vector.load %arg20[%c3_115, %c0_116] : memref<16x128xf32, #tpu.memory_space<vmem>>, vector<1x128xf32>
    %c0_117 = arith.constant 0 : index
    %c384 = arith.constant 384 : index
    %97 = vector.load %arg21[%c0_117, %c384] : memref<2x1024xf32, #tpu.memory_space<vmem>>, vector<1x128xf32>
    tpu.vector_store %arg21[%c0_117, %c384], %96 {strides = array<i32>} : memref<2x1024xf32, #tpu.memory_space<vmem>>, vector<1x128xf32>,
    %c4_118 = arith.constant 4 : index
    %c0_119 = arith.constant 0 : index
    %98 = vector.load %arg20[%c4_118, %c0_119] : memref<16x128xf32, #tpu.memory_space<vmem>>, vector<1x128xf32>
    %c0_120 = arith.constant 0 : index
    %c512 = arith.constant 512 : index
    %99 = vector.load %arg21[%c0_120, %c512] : memref<2x1024xf32, #tpu.memory_space<vmem>>, vector<1x128xf32>
    tpu.vector_store %arg21[%c0_120, %c512], %98 {strides = array<i32>} : memref<2x1024xf32, #tpu.memory_space<vmem>>, vector<1x128xf32>,
    %c5 = arith.constant 5 : index
    %c0_121 = arith.constant 0 : index
    %100 = vector.load %arg20[%c5, %c0_121] : memref<16x128xf32, #tpu.memory_space<vmem>>, vector<1x128xf32>
    %c0_122 = arith.constant 0 : index
    %c640 = arith.constant 640 : index
    %101 = vector.load %arg21[%c0_122, %c640] : memref<2x1024xf32, #tpu.memory_space<vmem>>, vector<1x128xf32>
    tpu.vector_store %arg21[%c0_122, %c640], %100 {strides = array<i32>} : memref<2x1024xf32, #tpu.memory_space<vmem>>, vector<1x128xf32>,
    %c6 = arith.constant 6 : index
    %c0_123 = arith.constant 0 : index
    %102 = vector.load %arg20[%c6, %c0_123] : memref<16x128xf32, #tpu.memory_space<vmem>>, vector<1x128xf32>
    %c0_124 = arith.constant 0 : index
    %c768 = arith.constant 768 : index
    %103 = vector.load %arg21[%c0_124, %c768] : memref<2x1024xf32, #tpu.memory_space<vmem>>, vector<1x128xf32>
    tpu.vector_store %arg21[%c0_124, %c768], %102 {strides = array<i32>} : memref<2x1024xf32, #tpu.memory_space<vmem>>, vector<1x128xf32>,
    %c7 = arith.constant 7 : index
    %c0_125 = arith.constant 0 : index
    %104 = vector.load %arg20[%c7, %c0_125] : memref<16x128xf32, #tpu.memory_space<vmem>>, vector<1x128xf32>
    %c0_126 = arith.constant 0 : index
    %c896 = arith.constant 896 : index
    %105 = vector.load %arg21[%c0_126, %c896] : memref<2x1024xf32, #tpu.memory_space<vmem>>, vector<1x128xf32>
    tpu.vector_store %arg21[%c0_126, %c896], %104 {strides = array<i32>} : memref<2x1024xf32, #tpu.memory_space<vmem>>, vector<1x128xf32>,
    %c8_127 = arith.constant 8 : index
    %c0_128 = arith.constant 0 : index
    %106 = vector.load %arg20[%c8_127, %c0_128] : memref<16x128xf32, #tpu.memory_space<vmem>>, vector<1x128xf32>
    %c1_129 = arith.constant 1 : index
    %c0_130 = arith.constant 0 : index
    %107 = vector.load %arg21[%c1_129, %c0_130] : memref<2x1024xf32, #tpu.memory_space<vmem>>, vector<1x128xf32>
    tpu.vector_store %arg21[%c1_129, %c0_130], %106 {strides = array<i32>} : memref<2x1024xf32, #tpu.memory_space<vmem>>, vector<1x128xf32>,
    %c9 = arith.constant 9 : index
    %c0_131 = arith.constant 0 : index
    %108 = vector.load %arg20[%c9, %c0_131] : memref<16x128xf32, #tpu.memory_space<vmem>>, vector<1x128xf32>
    %c1_132 = arith.constant 1 : index
    %c128_133 = arith.constant 128 : index
    %109 = vector.load %arg21[%c1_132, %c128_133] : memref<2x1024xf32, #tpu.memory_space<vmem>>, vector<1x128xf32>
    tpu.vector_store %arg21[%c1_132, %c128_133], %108 {strides = array<i32>} : memref<2x1024xf32, #tpu.memory_space<vmem>>, vector<1x128xf32>,
    %c10_134 = arith.constant 10 : index
    %c0_135 = arith.constant 0 : index
    %110 = vector.load %arg20[%c10_134, %c0_135] : memref<16x128xf32, #tpu.memory_space<vmem>>, vector<1x128xf32>
    %c1_136 = arith.constant 1 : index
    %c256_137 = arith.constant 256 : index
    %111 = vector.load %arg21[%c1_136, %c256_137] : memref<2x1024xf32, #tpu.memory_space<vmem>>, vector<1x128xf32>
    tpu.vector_store %arg21[%c1_136, %c256_137], %110 {strides = array<i32>} : memref<2x1024xf32, #tpu.memory_space<vmem>>, vector<1x128xf32>,
    %c11_138 = arith.constant 11 : index
    %c0_139 = arith.constant 0 : index
    %112 = vector.load %arg20[%c11_138, %c0_139] : memref<16x128xf32, #tpu.memory_space<vmem>>, vector<1x128xf32>
    %c1_140 = arith.constant 1 : index
    %c384_141 = arith.constant 384 : index
    %113 = vector.load %arg21[%c1_140, %c384_141] : memref<2x1024xf32, #tpu.memory_space<vmem>>, vector<1x128xf32>
    tpu.vector_store %arg21[%c1_140, %c384_141], %112 {strides = array<i32>} : memref<2x1024xf32, #tpu.memory_space<vmem>>, vector<1x128xf32>,
    %c12_142 = arith.constant 12 : index
    %c0_143 = arith.constant 0 : index
    %114 = vector.load %arg20[%c12_142, %c0_143] : memref<16x128xf32, #tpu.memory_space<vmem>>, vector<1x128xf32>
    %c1_144 = arith.constant 1 : index
    %c512_145 = arith.constant 512 : index
    %115 = vector.load %arg21[%c1_144, %c512_145] : memref<2x1024xf32, #tpu.memory_space<vmem>>, vector<1x128xf32>
    tpu.vector_store %arg21[%c1_144, %c512_145], %114 {strides = array<i32>} : memref<2x1024xf32, #tpu.memory_space<vmem>>, vector<1x128xf32>,
    %c13_146 = arith.constant 13 : index
    %c0_147 = arith.constant 0 : index
    %116 = vector.load %arg20[%c13_146, %c0_147] : memref<16x128xf32, #tpu.memory_space<vmem>>, vector<1x128xf32>
    %c1_148 = arith.constant 1 : index
    %c640_149 = arith.constant 640 : index
    %117 = vector.load %arg21[%c1_148, %c640_149] : memref<2x1024xf32, #tpu.memory_space<vmem>>, vector<1x128xf32>
    tpu.vector_store %arg21[%c1_148, %c640_149], %116 {strides = array<i32>} : memref<2x1024xf32, #tpu.memory_space<vmem>>, vector<1x128xf32>,
    %c14_150 = arith.constant 14 : index
    %c0_151 = arith.constant 0 : index
    %118 = vector.load %arg20[%c14_150, %c0_151] : memref<16x128xf32, #tpu.memory_space<vmem>>, vector<1x128xf32>
    %c1_152 = arith.constant 1 : index
    %c768_153 = arith.constant 768 : index
    %119 = vector.load %arg21[%c1_152, %c768_153] : memref<2x1024xf32, #tpu.memory_space<vmem>>, vector<1x128xf32>
    tpu.vector_store %arg21[%c1_152, %c768_153], %118 {strides = array<i32>} : memref<2x1024xf32, #tpu.memory_space<vmem>>, vector<1x128xf32>,
    %c15 = arith.constant 15 : index
    %c0_154 = arith.constant 0 : index
    %120 = vector.load %arg20[%c15, %c0_154] : memref<16x128xf32, #tpu.memory_space<vmem>>, vector<1x128xf32>
    %c1_155 = arith.constant 1 : index
    %c896_156 = arith.constant 896 : index
    %121 = vector.load %arg21[%c1_155, %c896_156] : memref<2x1024xf32, #tpu.memory_space<vmem>>, vector<1x128xf32>
    tpu.vector_store %arg21[%c1_155, %c896_156], %120 {strides = array<i32>} : memref<2x1024xf32, #tpu.memory_space<vmem>>, vector<1x128xf32>,
    %c0_157 = arith.constant 0 : index
    %c0_158 = arith.constant 0 : index
    %122 = vector.load %arg21[%c0_157, %c0_158] : memref<2x1024xf32, #tpu.memory_space<vmem>>, vector<2x1024xf32>
    %c0_159 = arith.constant 0 : index
    %c0_160 = arith.constant 0 : index
    %123 = vector.load %arg10[%c0_159, %c0_160] : memref<1024x128xf32, #tpu.memory_space<vmem>>, vector<1024x128xf32>
    %cst_161 = arith.constant dense<0.000000e+00> : vector<2x128xf32>
    %124 = tpu.matmul %122, %123, %cst_161 {dimension_numbers = #tpu.dot_dimension_numbers<[1], [0], [0], [1], [0, 0, 1, 1], [], []>} : vector<2x1024xf32>, vector<1024x128xf32>, vector<2x128xf32> -> vector<2x128xf32>
    %c0_162 = arith.constant 0 : index
    %c0_163 = arith.constant 0 : index
    %125 = vector.load %arg11[%c0_162, %c0_163] : memref<1x128xf32, #tpu.memory_space<vmem>>, vector<1x128xf32>
    %126 = vector.broadcast %125 : vector<1x128xf32> to vector<2x128xf32>
    %127 = arith.addf %124, %126 : vector<2x128xf32>
    %cst_164 = arith.constant 0.000000e+00 : f32
    %128 = vector.broadcast %cst_164 : f32 to vector<2x128xf32>
    %129 = arith.maximumf %127, %128 : vector<2x128xf32>
    %c0_165 = arith.constant 0 : index
    %c0_166 = arith.constant 0 : index
    %130 = vector.load %arg12[%c0_165, %c0_166] : memref<128x128xf32, #tpu.memory_space<vmem>>, vector<128x128xf32>
    %cst_167 = arith.constant dense<0.000000e+00> : vector<2x128xf32>
    %131 = tpu.matmul %129, %130, %cst_167 {dimension_numbers = #tpu.dot_dimension_numbers<[1], [0], [0], [1], [0, 0, 1, 1], [], []>} : vector<2x128xf32>, vector<128x128xf32>, vector<2x128xf32> -> vector<2x128xf32>
    %c0_168 = arith.constant 0 : index
    %c0_169 = arith.constant 0 : index
    %132 = vector.load %arg13[%c0_168, %c0_169] : memref<1x128xf32, #tpu.memory_space<vmem>>, vector<1x128xf32>
    %133 = vector.broadcast %132 : vector<1x128xf32> to vector<2x128xf32>
    %134 = arith.addf %131, %133 : vector<2x128xf32>
    %c0_170 = arith.constant 0 : index
    %c0_171 = arith.constant 0 : index
    %c0_172 = arith.constant 0 : index
    %135 = vector.load %arg14[%c0_170, %c0_171, %c0_172] : memref<1x2x128xf32, #tpu.memory_space<vmem>>, vector<1x2x128xf32>
    %136 = vector.shape_cast %135 : vector<1x2x128xf32> to vector<2x128xf32>
    %137 = vector.shape_cast %134 : vector<2x128xf32> to vector<1x2x128xf32>
    tpu.vector_store %arg14[%c0_170, %c0_171, %c0_172], %137 {strides = array<i32>} : memref<1x2x128xf32, #tpu.memory_space<vmem>>, vector<1x2x128xf32>,
    return
  }
  func.func @transform_0(%arg0: i32) -> (i32, i32, i32) {
    %c0_i32 = arith.constant 0 : i32
    %c0_i32_0 = arith.constant 0 : i32
    %c0_i32_1 = arith.constant 0 : i32
    return %arg0, %c0_i32, %c0_i32_0 : i32, i32, i32
  }
  func.func @transform_1(%arg0: i32) -> (i32, i32) {
    %c0_i32 = arith.constant 0 : i32
    %c0_i32_0 = arith.constant 0 : i32
    %c0_i32_1 = arith.constant 0 : i32
    return %c0_i32, %c0_i32_0 : i32, i32
  }
  func.func @transform_2(%arg0: i32) -> (i32, i32) {
    %c0_i32 = arith.constant 0 : i32
    %c0_i32_0 = arith.constant 0 : i32
    %c0_i32_1 = arith.constant 0 : i32
    return %c0_i32, %c0_i32_0 : i32, i32
  }
  func.func @transform_3(%arg0: i32) -> (i32, i32) {
    %c0_i32 = arith.constant 0 : i32
    %c0_i32_0 = arith.constant 0 : i32
    %c0_i32_1 = arith.constant 0 : i32
    return %c0_i32, %c0_i32_0 : i32, i32
  }
  func.func @transform_4(%arg0: i32) -> (i32, i32) {
    %c0_i32 = arith.constant 0 : i32
    %c0_i32_0 = arith.constant 0 : i32
    %c0_i32_1 = arith.constant 0 : i32
    return %c0_i32, %c0_i32_0 : i32, i32
  }
  func.func @transform_5(%arg0: i32) -> (i32, i32) {
    %c0_i32 = arith.constant 0 : i32
    %c0_i32_0 = arith.constant 0 : i32
    %c0_i32_1 = arith.constant 0 : i32
    return %c0_i32, %c0_i32_0 : i32, i32
  }
  func.func @transform_6(%arg0: i32) -> (i32, i32) {
    %c0_i32 = arith.constant 0 : i32
    %c0_i32_0 = arith.constant 0 : i32
    %c0_i32_1 = arith.constant 0 : i32
    return %c0_i32, %c0_i32_0 : i32, i32
  }
  func.func @transform_7(%arg0: i32) -> (i32, i32) {
    %c0_i32 = arith.constant 0 : i32
    %c0_i32_0 = arith.constant 0 : i32
    %c0_i32_1 = arith.constant 0 : i32
    return %c0_i32, %c0_i32_0 : i32, i32
  }
  func.func @transform_8(%arg0: i32) -> (i32, i32) {
    %c0_i32 = arith.constant 0 : i32
    %c0_i32_0 = arith.constant 0 : i32
    %c0_i32_1 = arith.constant 0 : i32
    return %c0_i32, %c0_i32_0 : i32, i32
  }
  func.func @transform_9(%arg0: i32) -> (i32, i32) {
    %c0_i32 = arith.constant 0 : i32
    %c0_i32_0 = arith.constant 0 : i32
    %c0_i32_1 = arith.constant 0 : i32
    return %c0_i32, %c0_i32_0 : i32, i32
  }
  func.func @transform_10(%arg0: i32) -> (i32, i32) {
    %c0_i32 = arith.constant 0 : i32
    %c0_i32_0 = arith.constant 0 : i32
    %c0_i32_1 = arith.constant 0 : i32
    return %c0_i32, %c0_i32_0 : i32, i32
  }
  func.func @transform_11(%arg0: i32) -> (i32, i32) {
    %c0_i32 = arith.constant 0 : i32
    %c0_i32_0 = arith.constant 0 : i32
    %c0_i32_1 = arith.constant 0 : i32
    return %c0_i32, %c0_i32_0 : i32, i32
  }
  func.func @transform_12(%arg0: i32) -> (i32, i32) {
    %c0_i32 = arith.constant 0 : i32
    %c0_i32_0 = arith.constant 0 : i32
    %c0_i32_1 = arith.constant 0 : i32
    return %c0_i32, %c0_i32_0 : i32, i32
  }
  func.func @transform_13(%arg0: i32) -> (i32, i32, i32) {
    %c0_i32 = arith.constant 0 : i32
    %c0_i32_0 = arith.constant 0 : i32
    %c0_i32_1 = arith.constant 0 : i32
    return %arg0, %c0_i32, %c0_i32_0 : i32, i32, i32
  }
}

</mosaic_0001>

<bundles_post_ra>
// kernel: tpu_custom_call.1
= control target key start
LH: loop header
LB: loop body
LE: loop exit
PB: predicated region body
PF: predicated region fallthrough
CT: control target
= control target key end

     0   :  { %18 = vsyncpa [#allocation10], 0  ;;  %s1503_s0 = inlined_call_operand.vmem [shape: f32[1,32,64], index: 0, kind: input, shape index: {}]   ;;  %s1504_s1 = inlined_call_operand.vmem [shape: f32[320,96], index: 1, kind: input, shape index: {}]   ;;  %s1505_s2 = inlined_call_operand.vmem [shape: f32[1,96], index: 2, kind: input, shape index: {}]   ;;  %s1506_s3 = inlined_call_operand.vmem [shape: f32[1,96], index: 3, kind: input, shape index: {}]   ;;  %s1507_s4 = inlined_call_operand.vmem [shape: f32[1,96], index: 4, kind: input, shape index: {}]   ;;  %s1508_s5 = inlined_call_operand.vmem [shape: f32[240,128], index: 5, kind: input, shape index: {}]   ;;  %s1509_s6 = inlined_call_operand.vmem [shape: f32[1,128], index: 6, kind: input, shape index: {}]   ;;  %s1510_s7 = inlined_call_operand.vmem [shape: f32[1,128], index: 7, kind: input, shape index: {}]   ;;  %s1511_s8 = inlined_call_operand.vmem [shape: f32[1,128], index: 8, kind: input, shape index: {}]   ;;  %s1512_s9 = inlined_call_operand.hbm [shape: f32[1024,128], index: 9, kind: input, shape index: {}]   ;;  %s1513_s10 = inlined_call_operand.vmem [shape: f32[1,128], index: 10, kind: input, shape index: {}]   ;;  %s1514_s11 = inlined_call_operand.vmem [shape: f32[128,128], index: 11, kind: input, shape index: {}]   ;;  %s1515_s12 = inlined_call_operand.vmem [shape: f32[1,128], index: 12, kind: input, shape index: {}]   ;;  %s1516_s13 = inlined_call_operand.hbm [shape: f32[1,2,128], index: 13, kind: output, shape index: {}]  }
   0x1   :  { %19 = vsyncpa [#allocation11], 0  ;;  %s42_s27 = sshll.u32 %s1512_s9, 4  ;;  %s1008_s28 = smov [#allocation9]   ;;  %s43_s27 = int_to_ptr.hbm [resolvable:$true] %s42_s27 }
   0x2   :  { %s44_s29 = sshll.u32 %s1008_s28, 4  ;;  %s1009_s30 = smov 128   ;;  %s45_s29 = int_to_ptr.vmem [resolvable:$true] %s44_s29 }
   0x3   :  { %s1010_s14 = smov 8  }
   0x4   :  { %50 = dma.hbm_to_vmem [thread:$0]  %s43_s27, 16384, %s45_s29, [#allocation10], %s1009_s30, %s1009_s30, %s1010_s14  }
   0x5   :  { %1004 = dma.done.wait [#allocation10], 16384  }
   0x6   :  { %1005 = vsyncadd [#allocation10], 4294950912  ;;  %v68_v0 = vld [vmem:[%s1503_s0 + $0x9] sm:$0xf]  ;;  %v67_v1 = vld [vmem:[%s1503_s0 + $0x1] sm:$0xff]  ;;  %s1011_s19 = smov 64  }
   0x7   :  { %73 = vrot.lane.b32.xlu1 %v68_v0, %s1011_s19  ;;  %71 = vrot.lane.b32.xlu0 %v67_v1, %s1011_s19  ;;  %v114_v2 = vld [vmem:[%s1503_s0 + $0x11] sm:$0xff]  ;;  %v157_v4 = vld [vmem:[%s1503_s0 + $0x1c] sm:$0xf]  ;;  %vm105_vm0 = vcmask 1043456   ;;  %vm63_vm1 = vcmask 523264   ;;  %vm65_vm2 = vcmask 519168  }
   0x8   :  { %v1104_v3 = vld [vmem:[%s1503_s0 + $0x14] sm:$0xff]  ;;  %v86_v5 = vld [vmem:[%s1503_s0 + $0xb] sm:$0xf]  ;;  %v161_v7 = vrot.slane %v157_v4, 4  ;;  %v118_v10 = vrot.slane %v114_v2, 4  ;;  %v85_v11 = vld [vmem:[%s1503_s0 + $0x3] sm:$0xff] }
   0x9   :  { %v160_v6 = vrot.slane %v1104_v3, 4  ;;  %91 = vrot.lane.b32.xlu2 %v86_v5, %s1011_s19  ;;  %v191_v8 = vld [vmem:[%s1504_s1 + $0x78] sm:$0xff]  ;;  %v190_v9 = vld [vmem:[%s1504_s1 + $0x70] sm:$0xff]  ;;  %v189_v13 = vld [vmem:[%s1504_s1 + $0x68] sm:$0xff]  ;;  %vm111_vm3 = vcmask 523268   ;;  %vm79_vm4 = vcmask 1043968  }
   0xa   :  { %229 = vmatpush.msra.mxu0 %v191_v8  ;;  %v207_v14 = vld [vmem:[%s1504_s1 + $0xf8] sm:$0xff]  ;;  %v206_v17 = vld [vmem:[%s1504_s1 + $0xf0] sm:$0xff]  ;;  %v188_v19 = vld [vmem:[%s1504_s1 + $0x60] sm:$0xff]  ;;  %vm127_vm5 = vcmask 1048068   ;;  %vm77_vm6 = vcmask 1048064   ;;  %vm324_vm7 = vcmask 785408  }
   0xb   :  { %v162_v12 = vsel %vm105_vm0, %v160_v6, %v161_v7  ;;  %v115_v15 = vld [vmem:[%s1503_s0 + $0x19] sm:$0xf]  ;;  %255 = vmatpush.msra.mxu1 %v207_v14  ;;  %v205_v20 = vld [vmem:[%s1504_s1 + $0xe8] sm:$0xff]  ;;  %v204_v23 = vld [vmem:[%s1504_s1 + $0xe0] sm:$0xff]  ;;  %165 = vst.msk [vmem:[#allocation2 + $0x28] sm:$0xf0] %vm111_vm3, %v160_v6 }
   0xc   :  { %166 = vst.msk [vmem:[#allocation2 + $0x40] sm:$0xff] %vm63_vm1, %v162_v12  ;;  %v141_v16 = vld [vmem:[%s1503_s0 + $0x13] sm:$0xff]  ;;  %230 = vmatpush.msra.mxu0 %v190_v9  ;;  %v142_v18 = vld [vmem:[%s1503_s0 + $0x1b] sm:$0xf]  ;;  %v119_v24 = vrot.slane %v115_v15, 4  ;;  %v185_v29 = vld [vmem:[%s1504_s1 + $0x48] sm:$0xff] }
   0xd   :  { %256 = vmatpush.msra.mxu1 %v206_v17  ;;  %v145_v21 = vrot.slane %v141_v16, 4  ;;  %v187_v22 = vld [vmem:[%s1504_s1 + $0x58] sm:$0xff]  ;;  %v146_v25 = vrot.slane %v142_v18, 4  ;;  %v186_v26 = vld [vmem:[%s1504_s1 + $0x50] sm:$0xff]  ;;  %v98_v32 = vld [vmem:[%s1503_s0 + $0xc] sm:$0xf] }
   0xe   :  { %231 = vmatpush.msra.mxu0 %v189_v13  ;;  %v203_v27 = vld [vmem:[%s1504_s1 + $0xd8] sm:$0xff]  ;;  %v202_v30 = vld [vmem:[%s1504_s1 + $0xd0] sm:$0xff]  ;;  %100 = vst.msk [vmem:[#allocation2 + $0x28] sm:$0xf] %vm65_vm2, %v98_v32  ;;  %v120_v33 = vsel %vm105_vm0, %v118_v10, %v119_v24  ;;  %v184_v35 = vld [vmem:[%s1504_s1 + $0x40] sm:$0xff]  ;;  %vm339_vm8 = vcmask 779264  }
   0xf   :  { %121 = vrot.lane.b32.xlu1 %v118_v10, %s1011_s19  ;;  %89 = vrot.lane.b32.xlu0 %v85_v11, %s1011_s19  ;;  %v215_v28 = vld [vmem:[%s1504_s1 + $0x138] sm:$0xff]  ;;  %v214_v31 = vld [vmem:[%s1504_s1 + $0x130] sm:$0xff]  ;;  %v147_v34 = vsel %vm105_vm0, %v145_v21, %v146_v25  ;;  %vm383_vm9 = vcmask 654336   ;;  %vm386_vm10 = vcmask 650240   ;;  %s1014_s16 = smov 32   ;;  %s1015_s17 = smov 80  }
  0x10   :  { %232 = vmatpush.msra.mxu0 %v188_v19  ;;  %257 = vmatpush.msra.mxu1 %v205_v20  ;;  %v201_v36 = vld [vmem:[%s1504_s1 + $0xc8] sm:$0xff]  ;;  %v183_v37 = vld [vmem:[%s1504_s1 + $0x38] sm:$0xff]  ;;  %v200_v38 = vld [vmem:[%s1504_s1 + $0xc0] sm:$0xff]  ;;  %vm395_vm11 = vcmask 1048192   ;;  %vm397_vm12 = vcmask 261120   ;;  %vm404_vm13 = vcmask 916736  }
  0x11   :  { %148 = vrot.lane.b32.xlu2 %v145_v21, %s1011_s19  ;;  %289 = vmatpush.msra.mxu2 %v215_v28  ;;  %v182_v39 = vld [vmem:[%s1504_s1 + $0x30] sm:$0xff]  ;;  %v181_v40 = vld [vmem:[%s1504_s1 + $0x28] sm:$0xff]  ;;  %v180_v41 = vld [vmem:[%s1504_s1 + $0x20] sm:$0xff]  ;;  %vm459_vm14 = vcmask 916480   ;;  %s924_s21 = sshll.u32 %s1516_s13, 4  ;;  %s925_s21 = int_to_ptr.hbm [resolvable:$true] %s924_s21 }
  0x12   :  { %233 = vmatpush.msra.mxu0 %v187_v22  ;;  %258 = vmatpush.msra.mxu1 %v204_v23  ;;  %v82_v42 = vld [vmem:[%s1503_s0 + $0xa] sm:$0xf]  ;;  %v61_v43 = vld [vmem:[%s1503_s0] sm:$0xff]  ;;  %v179_v45 = vld [vmem:[%s1504_s1 + $0x18] sm:$0xff] }
  0x13   :  { %290 = vmatpush.msra.mxu2 %v214_v31  ;;  %84 = vst.msk [vmem:[#allocation2 + $0x20] sm:$0xf] %vm65_vm2, %v82_v42  ;;  %v62_v44 = vld [vmem:[%s1503_s0 + $0x8] sm:$0xf]  ;;  %v199_v46 = vld [vmem:[%s1504_s1 + $0xb8] sm:$0xff]  ;;  %v178_v48 = vld [vmem:[%s1504_s1 + $0x10] sm:$0xff] }
  0x14   :  { %234 = vmatpush.msra.mxu0 %v186_v26  ;;  %259 = vmatpush.msra.mxu1 %v203_v27  ;;  %64 = vst.msk [vmem:[#allocation2] sm:$0xff] %vm63_vm1, %v61_v43  ;;  %v213_v47 = vld [vmem:[%s1504_s1 + $0x128] sm:$0xff]  ;;  %v198_v49 = vld [vmem:[%s1504_s1 + $0xb0] sm:$0xff]  ;;  %v212_v50 = vld [vmem:[%s1504_s1 + $0x120] sm:$0xff] }
  0x15   :  { %66 = vst.msk [vmem:[#allocation2 + $0x18] sm:$0xf] %vm65_vm2, %v62_v44  ;;  %291 = vmatpush.msra.mxu2 %v213_v47  ;;  %v177_v51 = vld [vmem:[%s1504_s1 + $0x8] sm:$0xff]  ;;  %v211_v53 = vld [vmem:[%s1504_s1 + $0x118] sm:$0xff]  ;;  %v176_v54 = vld [vmem:[%s1504_s1] sm:$0xff] }
  0x16   :  { %235 = vmatpush.msra.mxu0 %v185_v29  ;;  %260 = vmatpush.msra.mxu1 %v202_v30  ;;  %v197_v52 = vld [vmem:[%s1504_s1 + $0xa8] sm:$0xff]  ;;  %v196_v55 = vld [vmem:[%s1504_s1 + $0xa0] sm:$0xff]  ;;  %v130_v56 = vld [vmem:[%s1503_s0 + $0x12] sm:$0xff] }
  0x17   :  { %123 = vrot.lane.b32.xlu0 %v120_v33, %s1011_s19  ;;  %150 = vrot.lane.b32.xlu1 %v147_v34, %s1011_s19  ;;  %v101_v57 = vld [vmem:[%s1503_s0 + $0x10] sm:$0xff]  ;;  %v97_v58 = vld [vmem:[%s1503_s0 + $0x4] sm:$0xff]  ;;  %v134_v60 = vrot.slane %v130_v56, 4 }
  0x18   :  { %236 = vmatpush.msra.mxu0 %v184_v35  ;;  %261 = vmatpush.msra.mxu1 %v201_v36  ;;  %v210_v59 = vld [vmem:[%s1504_s1 + $0x110] sm:$0xff]  ;;  %v106_v61 = vrot.slane %v101_v57, 4  ;;  %99 = vst.msk [vmem:[#allocation2 + $0x10] sm:$0xff] %vm63_vm1, %v97_v58  ;;  %v81_v62 = vld [vmem:[%s1503_s0 + $0x2] sm:$0xff]  ;;  %v195_v0 = vld [vmem:[%s1504_s1 + $0x98] sm:$0xff] }
  0x19   :  { %292 = vmatpush.msra.mxu2 %v212_v50  ;;  %139 = vst.msk [vmem:[#allocation2 + $0x20] sm:$0xf0] %vm111_vm3, %v134_v60  ;;  %v209_v1 = vld [vmem:[%s1504_s1 + $0x108] sm:$0xff]  ;;  %v194_v2 = vld [vmem:[%s1504_s1 + $0x90] sm:$0xff]  ;;  %v208_v3 = vld [vmem:[%s1504_s1 + $0x100] sm:$0xff] }
  0x1a   :  { %237 = vmatpush.msra.mxu0 %v183_v37  ;;  %262 = vmatpush.msra.mxu1 %v200_v38  ;;  %112 = vst.msk [vmem:[#allocation2 + $0x18] sm:$0xf0] %vm111_vm3, %v106_v61  ;;  %v193_v4 = vld [vmem:[%s1504_s1 + $0x88] sm:$0xff]  ;;  %v192_v6 = vld [vmem:[%s1504_s1 + $0x80] sm:$0xff]  ;;  %v102_v8 = vld [vmem:[%s1503_s0 + $0x18] sm:$0xf] }
  0x1b   :  { %293 = vmatpush.msra.mxu2 %v211_v53  ;;  %83 = vst.msk [vmem:[#allocation2 + $0x8] sm:$0xff] %vm63_vm1, %v81_v62  ;;  %v131_v9 = vld [vmem:[%s1503_s0 + $0x1a] sm:$0xf]  ;;  %v107_v10 = vrot.slane %v102_v8, 4  ;;  %v172_v12 = vld [vmem:[#allocation2 + $0x28] sm:$0xff]  ;;  %v175_v15 = vld [vmem:[#allocation2 + $0x40] sm:$0xff] }
  0x1c   :  { %238 = vmatpush.msra.mxu0 %v182_v39  ;;  %263 = vmatpush.msra.mxu1 %v199_v46  ;;  %v135_v11 = vrot.slane %v131_v9, 4  ;;  %v948_v29 = vld [vmem:[%s1505_s2] ss:$0 sm:$0xff]  ;;  %s1012_s2 = smov 112  }
  0x1d   :  { %294 = vmatpush.msra.mxu2 %v210_v59  ;;  %v108_v13 = vsel %vm105_vm0, %v106_v61, %v107_v10  ;;  %v949_v36 = vld [vmem:[%s1506_s3] ss:$0 sm:$0xff]  ;;  %s1013_s3 = smov 120  }
  0x1e   :  { %239 = vmatpush.msra.mxu0 %v181_v40  ;;  %264 = vmatpush.msra.mxu1 %v198_v49  ;;  %v136_v14 = vsel %vm105_vm0, %v134_v60, %v135_v11  ;;  %113 = vst.msk [vmem:[#allocation2 + $0x30] sm:$0xff] %vm63_vm1, %v108_v13  ;;  %v950_v38 = vld [vmem:[%s1507_s4] ss:$0 sm:$0xff] }
  0x1f   :  { %295 = vmatpush.msra.mxu2 %v209_v1  ;;  %v169_v5 = vld [vmem:[#allocation2 + $0x10] sm:$0xff]  ;;  %140 = vst.msk [vmem:[#allocation2 + $0x38] sm:$0xff] %vm63_vm1, %v136_v14 }
  0x20   :  { %240 = vmatpush.msra.mxu0 %v180_v41  ;;  %265 = vmatpush.msra.mxu1 %v197_v52 }
  0x21   :  { %296 = vmatpush.msra.mxu2 %v208_v3 }
  0x22   :  { %241 = vmatpush.msra.mxu0 %v179_v45  ;;  %266 = vmatpush.msra.mxu1 %v196_v55 }
  0x23   :  { %934 = vmatmul.msk.f32.vlgmr.msra.gmra.mxu2 %vm63_vm1, %v169_v5 }
  0x24   :  { %242 = vmatpush.msra.mxu0 %v178_v48  ;;  %267 = vmatpush.msra.mxu1 %v195_v0 }
  0x26   :  { %243 = vmatpush.msra.mxu0 %v177_v51  ;;  %268 = vmatpush.msra.mxu1 %v194_v2 }
  0x28   :  { %244 = vmatpush.msra.mxu0 %v176_v54  ;;  %269 = vmatpush.msra.mxu1 %v193_v4 }
  0x2a   :  { %270 = vmatpush.msra.mxu1 %v192_v6 }
  0x2b   :  { %935 = vmatmul.msk.f32.gmra.mxu2 %vm63_vm1, %v172_v12 }
  0x33   :  { %936 = vmatmul.msk.f32.gmra.mxu2 %vm63_vm1, %v175_v15 }
  0x63   :  { %v92_v63 = vpop.permute.xlu2 %91 }
  0x64   :  { %96 = vst.msk [vmem:[#allocation2 + $0x20] sm:$0xf] %vm79_vm4, %v92_v63 }
  0x6b   :  { %v149_v7 = vpop.permute.xlu2 %148 }
  0x6c   :  { %154 = vst.msk [vmem:[#allocation2 + $0x20] sm:$0xf0] %vm127_vm5, %v149_v7 }
  0x73   :  { %v171_v26 = vld [vmem:[#allocation2 + $0x20] sm:$0xff] }
  0x79   :  { %v74_v16 = vpop.permute.xlu1 %73  ;;  %v72_v17 = vpop.permute.xlu0 %71 }
  0x7a   :  { %80 = vst.msk [vmem:[#allocation2 + $0x18] sm:$0xf] %vm79_vm4, %v74_v16 }
  0x7b   :  { %78 = vst.msk [vmem:[#allocation2] sm:$0xff] %vm77_vm6, %v72_v17 }
  0x81   :  { %v122_v18 = vpop.permute.xlu1 %121  ;;  %v90_v19 = vpop.permute.xlu0 %89 }
  0x82   :  { %128 = vst.msk [vmem:[#allocation2 + $0x18] sm:$0xf0] %vm127_vm5, %v122_v18  ;;  %v167_v20 = vld [vmem:[#allocation2] sm:$0xff]  ;;  %v440_v18 = vld [vmem:[%s1508_s5 + $0x78] sm:$0xff] }
  0x83   :  { %95 = vst.msk [vmem:[#allocation2 + $0x8] sm:$0xff] %vm77_vm6, %v90_v19  ;;  %245 = vmatmul.f32.vlgmr.msra.gmra.mxu0 %v167_v20  ;;  %v439_v19 = vld [vmem:[%s1508_s5 + $0x70] sm:$0xff]  ;;  %466 = vmatpush.msra.mxu3 %v440_v18  ;;  %v591_v18 = vld [vmem:[#allocation9 + $0xe8] sm:$0xff] }
  0x85   :  { %467 = vmatpush.msra.mxu3 %v439_v19  ;;  %v607_v19 = vld [vmem:[#allocation9 + $0x168] sm:$0xff] }
  0x89   :  { %v170_v21 = vld [vmem:[#allocation2 + $0x18] sm:$0xff]  ;;  %v124_v22 = vpop.permute.xlu0 %123  ;;  %v151_v23 = vpop.permute.xlu1 %150 }
  0x8a   :  { %v168_v24 = vld [vmem:[#allocation2 + $0x8] sm:$0xff]  ;;  %129 = vst.msk [vmem:[#allocation2 + $0x30] sm:$0xff] %vm77_vm6, %v124_v22 }
  0x8b   :  { %248 = vmatmul.f32.gmra.mxu0 %v170_v21  ;;  %271 = vmatmul.f32.vlgmr.msra.gmra.mxu1 %v168_v24  ;;  %155 = vst.msk [vmem:[#allocation2 + $0x38] sm:$0xff] %vm77_vm6, %v151_v23  ;;  %v438_v21 = vld [vmem:[%s1508_s5 + $0x68] sm:$0xff]  ;;  %v437_v24 = vld [vmem:[%s1508_s5 + $0x60] sm:$0xff] }
  0x8c   :  { %468 = vmatpush.msra.mxu3 %v438_v21  ;;  %v574_v21 = vld [vmem:[#allocation9 + $0x60] sm:$0xff] }
  0x8e   :  { %469 = vmatpush.msra.mxu3 %v437_v24  ;;  %v622_v24 = vld [vmem:[#allocation9 + $0x1e0] sm:$0xff] }
  0x91   :  { %v173_v25 = vld [vmem:[#allocation2 + $0x30] sm:$0xff] }
  0x92   :  { %v174_v27 = vld [vmem:[#allocation2 + $0x38] sm:$0xff] }
  0x93   :  { %274 = vmatmul.f32.gmra.mxu1 %v171_v26  ;;  %251 = vmatmul.f32.gmra.mxu0 %v173_v25  ;;  %v436_v25 = vld [vmem:[%s1508_s5 + $0x58] sm:$0xff]  ;;  %v435_v26 = vld [vmem:[%s1508_s5 + $0x50] sm:$0xff] }
  0x94   :  { %470 = vmatpush.msra.mxu3 %v436_v25  ;;  %v573_v25 = vld [vmem:[#allocation9 + $0x58] sm:$0xff] }
  0x96   :  { %471 = vmatpush.msra.mxu3 %v435_v26  ;;  %v589_v26 = vld [vmem:[#allocation9 + $0xd8] sm:$0xff] }
  0x9b   :  { %277 = vmatmul.f32.gmra.mxu1 %v174_v27  ;;  %v434_v27 = vld [vmem:[%s1508_s5 + $0x48] sm:$0xff] }
  0x9c   :  { %472 = vmatpush.msra.mxu3 %v434_v27  ;;  %v605_v27 = vld [vmem:[#allocation9 + $0x158] sm:$0xff] }
  0xa6   :  { %v298_v30 = vpop.f32.mrf.mxu2 }
  0xae   :  { %v301_v39 = vpop.f32.mrf.mxu2 }
  0xb6   :  { %v304_v51 = vpop.f32.mrf.mxu2 }
 0x100   :  { %v246_v28 = vpop.f32.mrf.mxu0 }
 0x101   :  { %v247_v31 = vadd.f32 %v948_v29, %v246_v28 }
 0x108   :  { %v272_v32 = vpop.f32.mrf.mxu1  ;;  %v249_v34 = vpop.f32.mrf.mxu0 }
 0x109   :  { %v273_v33 = vadd.f32 %v272_v32, %v247_v31  ;;  %v250_v40 = vadd.f32 %v948_v29, %v249_v34  ;;  %v432_v34 = vld [vmem:[%s1508_s5 + $0x38] sm:$0xff] }
 0x10b   :  { %v299_v35 = vadd.f32 %v298_v30, %v273_v33  ;;  %v433_v30 = vld [vmem:[%s1508_s5 + $0x40] sm:$0xff] }
 0x10c   :  { %473 = vmatpush.msra.mxu3 %v433_v30  ;;  %v588_v30 = vld [vmem:[#allocation9 + $0xd0] sm:$0xff] }
 0x10d   :  { %v307_v37 = vmax.f32 %v299_v35, 0.0  ;;  %v431_v35 = vld [vmem:[%s1508_s5 + $0x30] sm:$0xff] }
 0x10e   :  { %474 = vmatpush.msra.mxu3 %v432_v34  ;;  %v587_v34 = vld [vmem:[#allocation9 + $0xc8] sm:$0xff] }
 0x10f   :  { %v314_v41 = vmul.f32 %v949_v36, %v307_v37 }
 0x110   :  { %v275_v42 = vpop.f32.mrf.mxu1  ;;  %v252_v45 = vpop.f32.mrf.mxu0  ;;  %475 = vmatpush.msra.mxu3 %v431_v35  ;;  %v603_v35 = vld [vmem:[#allocation9 + $0x148] sm:$0xff] }
 0x111   :  { %v321_v43 = vadd.f32 %v950_v38, %v314_v41  ;;  %v276_v44 = vadd.f32 %v275_v42, %v250_v40  ;;  %v253_v48 = vadd.f32 %v948_v29, %v252_v45 }
 0x113   :  { %325 = vst.msk [vmem:[#allocation3] sm:$0xff] %vm324_vm7, %v321_v43  ;;  %v302_v46 = vadd.f32 %v301_v39, %v276_v44  ;;  %v429_v39 = vld [vmem:[%s1508_s5 + $0x20] sm:$0xff] }
 0x115   :  { %v308_v47 = vmax.f32 %v302_v46, 0.0 }
 0x117   :  { %v315_v49 = vmul.f32 %v949_v36, %v308_v47  ;;  %v428_v47 = vld [vmem:[%s1508_s5 + $0x18] sm:$0xff] }
 0x118   :  { %v278_v50 = vpop.f32.mrf.mxu1 }
 0x119   :  { %v322_v52 = vadd.f32 %v950_v38, %v315_v49  ;;  %v279_v53 = vadd.f32 %v278_v50, %v253_v48  ;;  %v427_v48 = vld [vmem:[%s1508_s5 + $0x10] sm:$0xff]  ;;  %v454_v49 = vld [vmem:[%s1508_s5 + $0xe8] sm:$0xff]  ;;  %v453_v50 = vld [vmem:[%s1508_s5 + $0xe0] sm:$0xff] }
 0x11a   :  { %v328_v58 = vld [vmem:[#allocation3] sm:$0xff]  ;;  %491 = vmatpush.msrb.mxu2 %v454_v49  ;;  %v567_v49 = vld [vmem:[#allocation9 + $0x28] sm:$0xff] }
 0x11b   :  { %326 = vst.msk [vmem:[#allocation3 + $0x8] sm:$0xff] %vm324_vm7, %v322_v52  ;;  %v305_v54 = vadd.f32 %v304_v51, %v279_v53  ;;  %v426_v51 = vld [vmem:[%s1508_s5 + $0x8] sm:$0xff]  ;;  %v425_v52 = vld [vmem:[%s1508_s5] sm:$0xff]  ;;  %v452_v53 = vld [vmem:[%s1508_s5 + $0xd8] sm:$0xff] }
 0x11c   :  { %492 = vmatpush.msrb.mxu2 %v453_v50  ;;  %v583_v50 = vld [vmem:[#allocation9 + $0xa8] sm:$0xff] }
 0x11d   :  { %v309_v55 = vmax.f32 %v305_v54, 0.0  ;;  %v451_v54 = vld [vmem:[%s1508_s5 + $0xd0] sm:$0xff] }
 0x11e   :  { %493 = vmatpush.msrb.mxu2 %v452_v53  ;;  %v566_v53 = vld [vmem:[#allocation9 + $0x20] sm:$0xff] }
 0x11f   :  { %v316_v56 = vmul.f32 %v949_v36, %v309_v55  ;;  %v430_v36 = vld [vmem:[%s1508_s5 + $0x28] sm:$0xff] }
 0x120   :  { %476 = vmatpush.msra.mxu3 %v430_v36  ;;  %v450_v55 = vld [vmem:[%s1508_s5 + $0xc8] sm:$0xff]  ;;  %494 = vmatpush.msrb.mxu2 %v451_v54  ;;  %v619_v36 = vld [vmem:[#allocation9 + $0x1c8] sm:$0xff]  ;;  %v582_v54 = vld [vmem:[#allocation9 + $0xa0] sm:$0xff] }
 0x121   :  { %v323_v57 = vadd.f32 %v950_v38, %v316_v56  ;;  %v449_v56 = vld [vmem:[%s1508_s5 + $0xc0] sm:$0xff] }
 0x122   :  { %v330_v59 = vld [vmem:[#allocation3 + $0x1] sm:$0xff]  ;;  %v331_v62 = vld [vmem:[#allocation3 + $0x9] sm:$0x3]  ;;  %477 = vmatpush.msra.mxu3 %v429_v39  ;;  %495 = vmatpush.msrb.mxu2 %v450_v55 }
 0x123   :  { %v329_v60 = vld [vmem:[#allocation3 + $0x8] sm:$0x3]  ;;  %327 = vst.msk [vmem:[#allocation3 + $0x10] sm:$0xff] %vm324_vm7, %v323_v57  ;;  %v332_v61 = vmax.f32 %v328_v58, %v330_v59  ;;  %v335_v2 = vld [vmem:[#allocation3 + $0xa] sm:$0x3]  ;;  %v447_v58 = vld [vmem:[%s1508_s5 + $0xb0] sm:$0xff] }
 0x124   :  { %v334_v63 = vld [vmem:[#allocation3 + $0x2] sm:$0xff]  ;;  %v333_v0 = vmax.f32 %v329_v60, %v331_v62  ;;  %478 = vmatpush.msra.mxu3 %v428_v47  ;;  %496 = vmatpush.msrb.mxu2 %v449_v56  ;;  %v446_v59 = vld [vmem:[%s1508_s5 + $0xa8] sm:$0xff]  ;;  %v445_v60 = vld [vmem:[%s1508_s5 + $0xa0] sm:$0xff] }
 0x125   :  { %v336_v1 = vmax.f32 %v332_v61, %v334_v63  ;;  %v448_v57 = vld [vmem:[%s1508_s5 + $0xb8] sm:$0xff]  ;;  %v443_v62 = vld [vmem:[%s1508_s5 + $0x90] sm:$0xff]  ;;  %v442_v63 = vld [vmem:[%s1508_s5 + $0x88] sm:$0xff] }
 0x126   :  { %v337_v3 = vmax.f32 %v333_v0, %v335_v2  ;;  %479 = vmatpush.msra.mxu3 %v427_v48  ;;  %497 = vmatpush.msrb.mxu2 %v448_v57  ;;  %v444_v61 = vld [vmem:[%s1508_s5 + $0x98] sm:$0xff]  ;;  %v441_v0 = vld [vmem:[%s1508_s5 + $0x80] sm:$0xff]  ;;  %v600_v47 = vld [vmem:[#allocation9 + $0x130] sm:$0xff] }
 0x127   :  { %338 = vst.msk [vmem:[#allocation4] sm:$0xff] %vm324_vm7, %v336_v1  ;;  %v602_v39 = vld [vmem:[#allocation9 + $0x140] sm:$0xff]  ;;  %v616_v48 = vld [vmem:[#allocation9 + $0x1b0] sm:$0xff]  ;;  %v565_v57 = vld [vmem:[#allocation9 + $0x18] sm:$0xff] }
 0x128   :  { %340 = vst.msk [vmem:[#allocation4 + $0x8] sm:$0x3] %vm339_vm8, %v337_v3  ;;  %480 = vmatpush.msra.mxu3 %v426_v51  ;;  %498 = vmatpush.msrb.mxu2 %v447_v58  ;;  %v599_v51 = vld [vmem:[#allocation9 + $0x128] sm:$0xff]  ;;  %v598_v55 = vld [vmem:[#allocation9 + $0x120] sm:$0xff]  ;;  %v581_v58 = vld [vmem:[#allocation9 + $0x98] sm:$0xff] }
 0x129   :  { %v614_v56 = vld [vmem:[#allocation9 + $0x1a0] sm:$0xff] }
 0x12a   :  { %v341_v4 = vld [vmem:[#allocation3 + $0xc] sm:$0xff]  ;;  %v342_v7 = vld [vmem:[#allocation3 + $0x14] sm:$0x3]  ;;  %v348_v12 = vld [vmem:[#allocation3 + $0x16] sm:$0x3]  ;;  %481 = vmatpush.msra.mxu3 %v425_v52  ;;  %499 = vmatpush.msrb.mxu2 %v446_v59 }
 0x12b   :  { %v343_v5 = vld [vmem:[#allocation3 + $0xd] sm:$0xff]  ;;  %v344_v8 = vld [vmem:[#allocation3 + $0x15] sm:$0x3]  ;;  %v597_v59 = vld [vmem:[#allocation9 + $0x118] sm:$0xff] }
 0x12c   :  { %v345_v6 = vmax.f32 %v341_v4, %v343_v5  ;;  %v347_v9 = vld [vmem:[#allocation3 + $0xe] sm:$0xff]  ;;  %v346_v10 = vmax.f32 %v342_v7, %v344_v8  ;;  %500 = vmatpush.msrb.mxu2 %v445_v60 }
 0x12d   :  { %v615_v52 = vld [vmem:[#allocation9 + $0x1a8] sm:$0xff] }
 0x12e   :  { %v349_v11 = vmax.f32 %v345_v6, %v347_v9  ;;  %v353_v13 = vld [vmem:[#allocation4] sm:$0xff]  ;;  %v350_v14 = vmax.f32 %v346_v10, %v348_v12  ;;  %501 = vmatpush.msrb.mxu2 %v444_v61  ;;  %v577_v9 = vld [vmem:[#allocation9 + $0x78] sm:$0xff]  ;;  %v1428_v60 = vld [vmem:[%s1509_s6] ss:$0 sm:$0xff] }
 0x12f   :  { %371 = vrot.lane.b32.xlu1 %v353_v13, %s1012_s2  ;;  %359 = vrot.lane.b32.xlu2 %v353_v13, %s1013_s3  ;;  %v593_v10 = vld [vmem:[#allocation9 + $0xf8] sm:$0xff] }
 0x130   :  { %351 = vst.msk [vmem:[#allocation4 + $0xa] sm:$0xff] %vm324_vm7, %v349_v11  ;;  %502 = vmatpush.msrb.mxu2 %v443_v62  ;;  %v609_v11 = vld [vmem:[#allocation9 + $0x178] sm:$0xff]  ;;  %715 = vmatpush.msrb.mxu0 %v577_v9  ;;  %v564_v62 = vld [vmem:[#allocation9 + $0x10] sm:$0xff]  ;;  %v578_v9 = vld [vmem:[#allocation9 + $0x80] sm:$0xff] }
 0x131   :  { %352 = vst.msk [vmem:[#allocation4 + $0x12] sm:$0x3] %vm339_vm8, %v350_v14  ;;  %735 = vmatpush.msrb.mxu1 %v593_v10  ;;  %v625_v12 = vld [vmem:[#allocation9 + $0x1f8] sm:$0xff]  ;;  %v592_v14 = vld [vmem:[#allocation9 + $0xf0] sm:$0xff]  ;;  %755 = vmatpush.msrb.mxu3 %v609_v11  ;;  %v594_v10 = vld [vmem:[#allocation9 + $0x100] sm:$0xff] }
 0x132   :  { %503 = vmatpush.msrb.mxu2 %v442_v63  ;;  %v613_v61 = vld [vmem:[#allocation9 + $0x198] sm:$0xff]  ;;  %v580_v63 = vld [vmem:[#allocation9 + $0x90] sm:$0xff] }
 0x133   :  { %736 = vmatpush.msrb.mxu1 %v592_v14  ;;  %v657_v14 = vld [vmem:[#allocation9 + $0x2f8] sm:$0xff] }
 0x134   :  { %504 = vmatpush.msrb.mxu2 %v441_v0  ;;  %v596_v0 = vld [vmem:[#allocation9 + $0x110] sm:$0xff] }
 0x135   :  { %737 = vmatpush.msrb.mxu1 %v591_v18  ;;  %v689_v18 = vld [vmem:[#allocation9 + $0x3f8] sm:$0xff] }
 0x136   :  { %775 = vmatpush.msra.mxu2 %v625_v12  ;;  %v610_v12 = vld [vmem:[#allocation9 + $0x180] sm:$0xff] }
 0x137   :  { %v354_v15 = vld [vmem:[#allocation4 + $0x8] sm:$0xff] }
 0x138   :  { %361 = vrot.lane.b32.xlu0 %v354_v15, %s1013_s3  ;;  %v355_v16 = vld [vmem:[#allocation4 + $0x10] sm:$0xf]  ;;  %373 = vrot.lane.b32.xlu2 %v354_v15, %s1012_s2 }
 0x139   :  { %375 = vrot.lane.b32.xlu1 %v355_v16, %s1012_s2 }
 0x140   :  { %363 = vrot.lane.b32.xlu0 %v355_v16, %s1013_s3 }
 0x189   :  { %v360_v17 = vpop.permute.xlu2 %359 }
 0x18a   :  { %v368_v20 = vmax.f32 %v353_v13, %v360_v17  ;;  %v576_v13 = vld [vmem:[#allocation9 + $0x70] sm:$0xff]  ;;  %v575_v17 = vld [vmem:[#allocation9 + $0x68] sm:$0xff] }
 0x18b   :  { %716 = vmatpush.msrb.mxu0 %v576_v13  ;;  %v641_v13 = vld [vmem:[#allocation9 + $0x278] sm:$0xff] }
 0x18d   :  { %717 = vmatpush.msrb.mxu0 %v575_v17  ;;  %v673_v17 = vld [vmem:[#allocation9 + $0x378] sm:$0xff] }
 0x18f   :  { %718 = vmatpush.msrb.mxu0 %v574_v21  ;;  %v672_v21 = vld [vmem:[#allocation9 + $0x370] sm:$0xff] }
 0x191   :  { %719 = vmatpush.msrb.mxu0 %v573_v25  ;;  %v639_v25 = vld [vmem:[#allocation9 + $0x268] sm:$0xff] }
 0x192   :  { %v374_v31 = vpop.permute.xlu2 %373 }
 0x1a1   :  { %v372_v22 = vpop.permute.xlu1 %371 }
 0x1a2   :  { %v380_v23 = vmax.f32 %v368_v20, %v372_v22  ;;  %v623_v20 = vld [vmem:[#allocation9 + $0x1e8] sm:$0xff]  ;;  %v590_v22 = vld [vmem:[#allocation9 + $0xe0] sm:$0xff] }
 0x1a3   :  { %738 = vmatpush.msrb.mxu1 %v590_v22 }
 0x1a4   :  { %384 = vst.msk [vmem:[#allocation5] sm:$0xff] %vm383_vm9, %v380_v23  ;;  %v606_v23 = vld [vmem:[#allocation9 + $0x160] sm:$0xff] }
 0x1a5   :  { %739 = vmatpush.msrb.mxu1 %v589_v26  ;;  %v655_v26 = vld [vmem:[#allocation9 + $0x2e8] sm:$0xff] }
 0x1a7   :  { %740 = vmatpush.msrb.mxu1 %v588_v30  ;;  %v638_v30 = vld [vmem:[#allocation9 + $0x260] sm:$0xff] }
 0x1a9   :  { %741 = vmatpush.msrb.mxu1 %v587_v34  ;;  %v686_v34 = vld [vmem:[#allocation9 + $0x3e0] sm:$0xff] }
 0x1aa   :  { %v362_v28 = vpop.permute.xlu0 %361 }
 0x1ab   :  { %v369_v29 = vmax.f32 %v354_v15, %v362_v28  ;;  %v388_v32 = vld [vmem:[#allocation5] sm:$0xff]  ;;  %v376_v40 = vpop.permute.xlu1 %375  ;;  %v608_v15 = vld [vmem:[#allocation9 + $0x170] sm:$0xff]  ;;  %v621_v28 = vld [vmem:[#allocation9 + $0x1d8] sm:$0xff] }
 0x1ac   :  { %389 = vst.msk [vmem:[#allocation6] sm:$0xff] %vm383_vm9, %v388_v32  ;;  %756 = vmatpush.msrb.mxu3 %v608_v15  ;;  %v620_v32 = vld [vmem:[#allocation9 + $0x1d0] sm:$0xff] }
 0x1ad   :  { %v381_v33 = vmax.f32 %v369_v29, %v374_v31  ;;  %v572_v29 = vld [vmem:[#allocation9 + $0x50] sm:$0xff] }
 0x1ae   :  { %757 = vmatpush.msrb.mxu3 %v607_v19  ;;  %v604_v31 = vld [vmem:[#allocation9 + $0x150] sm:$0xff]  ;;  %720 = vmatpush.msrb.mxu0 %v572_v29  ;;  %v687_v29 = vld [vmem:[#allocation9 + $0x3e8] sm:$0xff] }
 0x1af   :  { %385 = vst.msk [vmem:[#allocation5 + $0x8] sm:$0xff] %vm383_vm9, %v381_v33  ;;  %v571_v33 = vld [vmem:[#allocation9 + $0x48] sm:$0xff]  ;;  %v640_v19 = vld [vmem:[#allocation9 + $0x270] sm:$0xff] }
 0x1b0   :  { %758 = vmatpush.msrb.mxu3 %v606_v23  ;;  %721 = vmatpush.msrb.mxu0 %v571_v33  ;;  %v1439_v23 = vld [vmem:[%s1511_s8] ss:$0 sm:$0xff] }
 0x1b2   :  { %v364_v37 = vpop.permute.xlu0 %363  ;;  %759 = vmatpush.msrb.mxu3 %v605_v27  ;;  %v671_v27 = vld [vmem:[#allocation9 + $0x368] sm:$0xff] }
 0x1b3   :  { %v370_v38 = vmax.f32 %v355_v16, %v364_v37  ;;  %v624_v16 = vld [vmem:[#allocation9 + $0x1f0] sm:$0xff]  ;;  %v570_v37 = vld [vmem:[#allocation9 + $0x40] sm:$0xff] }
 0x1b4   :  { %776 = vmatpush.msra.mxu2 %v624_v16  ;;  %760 = vmatpush.msrb.mxu3 %v604_v31  ;;  %v1434_v16 = vld [vmem:[%s1510_s7] ss:$0 sm:$0xff]  ;;  %v654_v31 = vld [vmem:[#allocation9 + $0x2e0] sm:$0xff] }
 0x1b5   :  { %v382_v41 = vmax.f32 %v370_v38, %v376_v40  ;;  %v586_v38 = vld [vmem:[#allocation9 + $0xc0] sm:$0xff]  ;;  %722 = vmatpush.msrb.mxu0 %v570_v37  ;;  %v653_v37 = vld [vmem:[#allocation9 + $0x2d8] sm:$0xff] }
 0x1b6   :  { %v399_v42 = vld [vmem:[#allocation5 + $0x2] sm:$0xff]  ;;  %777 = vmatpush.msra.mxu2 %v623_v20  ;;  %761 = vmatpush.msrb.mxu3 %v603_v35  ;;  %v618_v40 = vld [vmem:[#allocation9 + $0x1c0] sm:$0xff] }
 0x1b7   :  { %v390_v43 = vld [vmem:[#allocation5 + $0x1] sm:$0xff]  ;;  %387 = vst.msk [vmem:[#allocation5 + $0x10] sm:$0xf] %vm386_vm10, %v382_v41  ;;  %401 = vrot.lane.b32.xlu0 %v399_v42, %s1014_s16  ;;  %742 = vmatpush.msrb.mxu1 %v586_v38  ;;  %v569_v41 = vld [vmem:[#allocation9 + $0x38] sm:$0xff] }
 0x1b8   :  { %392 = vrot.lane.b32.xlu2 %v390_v43, %s1015_s17  ;;  %778 = vmatpush.msra.mxu2 %v622_v24  ;;  %v585_v42 = vld [vmem:[#allocation9 + $0xb8] sm:$0xff]  ;;  %v656_v20 = vld [vmem:[#allocation9 + $0x2f0] sm:$0xff] }
 0x1b9   :  { %762 = vmatpush.msrb.mxu3 %v602_v39  ;;  %v601_v43 = vld [vmem:[#allocation9 + $0x138] sm:$0xff]  ;;  %723 = vmatpush.msrb.mxu0 %v569_v41  ;;  %v688_v24 = vld [vmem:[#allocation9 + $0x3f0] sm:$0xff] }
 0x1ba   :  { %779 = vmatpush.msra.mxu2 %v621_v28  ;;  %743 = vmatpush.msrb.mxu1 %v585_v42  ;;  %v669_v38 = vld [vmem:[#allocation9 + $0x358] sm:$0xff]  ;;  %v636_v41 = vld [vmem:[#allocation9 + $0x250] sm:$0xff] }
 0x1bb   :  { %763 = vmatpush.msrb.mxu3 %v601_v43  ;;  %v652_v42 = vld [vmem:[#allocation9 + $0x2d0] sm:$0xff] }
 0x1bc   :  { %780 = vmatpush.msra.mxu2 %v620_v32  ;;  %v670_v32 = vld [vmem:[#allocation9 + $0x360] sm:$0xff] }
 0x1bd   :  { %764 = vmatpush.msrb.mxu3 %v600_v47  ;;  %v635_v47 = vld [vmem:[#allocation9 + $0x248] sm:$0xff] }
 0x1be   :  { %v408_v44 = vld [vmem:[#allocation5 + $0xb] sm:$0xff]  ;;  %781 = vmatpush.msra.mxu2 %v619_v36 }
 0x1bf   :  { %v415_v45 = vld [vmem:[#allocation5 + $0xc] sm:$0xff]  ;;  %410 = vrot.lane.b32.xlu1 %v408_v44, %s1015_s17  ;;  %765 = vmatpush.msrb.mxu3 %v599_v51  ;;  %s1016_s17 = smov [#allocation12]  }
 0x1c0   :  { %v406_v46 = vld [vmem:[#allocation5 + $0xa] sm:$0xff]  ;;  %417 = vrot.lane.b32.xlu2 %v415_v45, %s1014_s16  ;;  %782 = vmatpush.msra.mxu2 %v618_v40  ;;  %s922_s18 = sshll.u32 %s1016_s17, 4  ;;  %s923_s18 = int_to_ptr.vmem [resolvable:$true] %s922_s18 }
 0x1c1   :  { %407 = vst.msk [vmem:[#allocation6 + $0x10] sm:$0xff] %vm383_vm9, %v406_v46  ;;  %v617_v44 = vld [vmem:[#allocation9 + $0x1b8] sm:$0xff]  ;;  %v568_v45 = vld [vmem:[#allocation9 + $0x30] sm:$0xff]  ;;  %766 = vmatpush.msrb.mxu3 %v598_v55  ;;  %v682_v55 = vld [vmem:[#allocation9 + $0x3c0] sm:$0xff] }
 0x1c2   :  { %783 = vmatpush.msra.mxu2 %v617_v44  ;;  %v584_v46 = vld [vmem:[#allocation9 + $0xb0] sm:$0xff]  ;;  %724 = vmatpush.msrb.mxu0 %v568_v45  ;;  %v637_v36 = vld [vmem:[#allocation9 + $0x258] sm:$0xff] }
 0x1c3   :  { %744 = vmatpush.msrb.mxu1 %v584_v46  ;;  %767 = vmatpush.msrb.mxu3 %v597_v59  ;;  %v685_v40 = vld [vmem:[#allocation9 + $0x3d8] sm:$0xff]  ;;  %v668_v44 = vld [vmem:[#allocation9 + $0x350] sm:$0xff] }
 0x1c4   :  { %784 = vmatpush.msra.mxu2 %v616_v48  ;;  %725 = vmatpush.msrb.mxu0 %v567_v49  ;;  %v684_v45 = vld [vmem:[#allocation9 + $0x3d0] sm:$0xff]  ;;  %v651_v48 = vld [vmem:[#allocation9 + $0x2c8] sm:$0xff]  ;;  %v681_v59 = vld [vmem:[#allocation9 + $0x3b8] sm:$0xff] }
 0x1c5   :  { %745 = vmatpush.msrb.mxu1 %v583_v50  ;;  %768 = vmatpush.msrb.mxu3 %v596_v0  ;;  %v667_v49 = vld [vmem:[#allocation9 + $0x348] sm:$0xff] }
 0x1c6   :  { %785 = vmatpush.msra.mxu2 %v615_v52  ;;  %726 = vmatpush.msrb.mxu0 %v566_v53  ;;  %v683_v50 = vld [vmem:[#allocation9 + $0x3c8] sm:$0xff]  ;;  %v634_v52 = vld [vmem:[#allocation9 + $0x240] sm:$0xff] }
 0x1c7   :  { %746 = vmatpush.msrb.mxu1 %v582_v54  ;;  %v650_v53 = vld [vmem:[#allocation9 + $0x2c0] sm:$0xff] }
 0x1c8   :  { %786 = vmatpush.msra.mxu2 %v614_v56  ;;  %727 = vmatpush.msrb.mxu0 %v565_v57  ;;  %v666_v54 = vld [vmem:[#allocation9 + $0x340] sm:$0xff]  ;;  %v633_v56 = vld [vmem:[#allocation9 + $0x238] sm:$0xff] }
 0x1c9   :  { %747 = vmatpush.msrb.mxu1 %v581_v58  ;;  %v649_v57 = vld [vmem:[#allocation9 + $0x2b8] sm:$0xff] }
 0x1ca   :  { %787 = vmatpush.msra.mxu2 %v613_v61  ;;  %728 = vmatpush.msrb.mxu0 %v564_v62  ;;  %v665_v58 = vld [vmem:[#allocation9 + $0x338] sm:$0xff] }
 0x1cb   :  { %748 = vmatpush.msrb.mxu1 %v580_v63 }
 0x212   :  { %v393_v1 = vpop.permute.xlu2 %392 }
 0x213   :  { %396 = vst.msk [vmem:[#allocation6] sm:$0xff] %vm395_vm11, %v393_v1 }
 0x214   :  { %398 = vst.msk [vmem:[#allocation6 + $0x8] sm:$0xff] %vm397_vm12, %v393_v1 }
 0x21a   :  { %v421_v2 = vld [vmem:[#allocation6] sm:$0xff]  ;;  %v418_v6 = vpop.permute.xlu2 %417 }
 0x21b   :  { %482 = vmatmul.f32.vlgmr.msra.gmra.mxu3 %v421_v2  ;;  %v612_v2 = vld [vmem:[#allocation9 + $0x190] sm:$0xff] }
 0x21c   :  { %788 = vmatpush.msra.mxu2 %v612_v2  ;;  %v648_v2 = vld [vmem:[#allocation9 + $0x2b0] sm:$0xff] }
 0x229   :  { %v402_v3 = vpop.permute.xlu0 %401 }
 0x22a   :  { %405 = vst.msk [vmem:[#allocation6 + $0x8] sm:$0xff] %vm404_vm13, %v402_v3  ;;  %v563_v3 = vld [vmem:[#allocation9 + $0x8] sm:$0xff] }
 0x22b   :  { %729 = vmatpush.msrb.mxu0 %v563_v3 }
 0x231   :  { %v411_v4 = vpop.permute.xlu1 %410  ;;  %v422_v5 = vld [vmem:[#allocation6 + $0x8] sm:$0xff] }
 0x232   :  { %413 = vst.msk [vmem:[#allocation6 + $0x10] sm:$0xff] %vm395_vm11, %v411_v4  ;;  %937 = vmatmul.msk.f32.vlgmr.msrb.gmra.mxu2 %vm459_vm14, %v422_v5  ;;  %v595_v5 = vld [vmem:[#allocation9 + $0x108] sm:$0xff] }
 0x233   :  { %414 = vst.msk [vmem:[#allocation6 + $0x18] sm:$0xff] %vm397_vm12, %v411_v4  ;;  %v579_v4 = vld [vmem:[#allocation9 + $0x88] sm:$0xff]  ;;  %769 = vmatpush.msrb.mxu3 %v595_v5  ;;  %v680_v5 = vld [vmem:[#allocation9 + $0x3b0] sm:$0xff] }
 0x234   :  { %420 = vst.msk [vmem:[#allocation6 + $0x18] sm:$0xff] %vm404_vm13, %v418_v6  ;;  %749 = vmatpush.msrb.mxu1 %v579_v4  ;;  %v611_v6 = vld [vmem:[#allocation9 + $0x188] sm:$0xff]  ;;  %v664_v4 = vld [vmem:[#allocation9 + $0x330] sm:$0xff] }
 0x235   :  { %789 = vmatpush.msra.mxu2 %v611_v6  ;;  %770 = vmatpush.msrb.mxu3 %v594_v10  ;;  %v663_v10 = vld [vmem:[#allocation9 + $0x328] sm:$0xff] }
 0x236   :  { %750 = vmatpush.msrb.mxu1 %v578_v9 }
 0x237   :  { %790 = vmatpush.msra.mxu2 %v610_v12  ;;  %835 = vmatpush.msra.mxu3 %v673_v17  ;;  %v678_v17 = vld [vmem:[#allocation9 + $0x3a0] sm:$0xff] }
 0x238   :  { %815 = vmatpush.msra.mxu1 %v657_v14  ;;  %v630_v14 = vld [vmem:[#allocation9 + $0x220] sm:$0xff] }
 0x239   :  { %v423_v7 = vld [vmem:[#allocation6 + $0x10] sm:$0xff]  ;;  %855 = vmatpush.msrb.mxu2 %v689_v18  ;;  %836 = vmatpush.msra.mxu3 %v672_v21  ;;  %v629_v18 = vld [vmem:[#allocation9 + $0x218] sm:$0xff] }
 0x23a   :  { %485 = vmatmul.f32.gmra.mxu3 %v423_v7  ;;  %816 = vmatpush.msra.mxu1 %v656_v20  ;;  %v661_v20 = vld [vmem:[#allocation9 + $0x318] sm:$0xff] }
 0x23b   :  { %v424_v8 = vld [vmem:[#allocation6 + $0x18] sm:$0xff]  ;;  %856 = vmatpush.msrb.mxu2 %v688_v24  ;;  %837 = vmatpush.msra.mxu3 %v671_v27  ;;  %v660_v24 = vld [vmem:[#allocation9 + $0x310] sm:$0xff]  ;;  %v643_v27 = vld [vmem:[#allocation9 + $0x288] sm:$0xff] }
 0x23c   :  { %938 = vmatmul.msk.f32.gmra.mxu2 %vm459_vm14, %v424_v8  ;;  %v562_v8 = vld [vmem:[#allocation9] sm:$0xff]  ;;  %817 = vmatpush.msra.mxu1 %v655_v26  ;;  %v677_v21 = vld [vmem:[#allocation9 + $0x398] sm:$0xff]  ;;  %v627_v26 = vld [vmem:[#allocation9 + $0x208] sm:$0xff] }
 0x23d   :  { %730 = vmatpush.msrb.mxu0 %v562_v8  ;;  %857 = vmatpush.msrb.mxu2 %v687_v29  ;;  %v647_v8 = vld [vmem:[#allocation9 + $0x2a8] sm:$0xff] }
 0x23e   :  { %818 = vmatpush.msra.mxu1 %v654_v31  ;;  %838 = vmatpush.msra.mxu3 %v670_v32  ;;  %v675_v29 = vld [vmem:[#allocation9 + $0x388] sm:$0xff]  ;;  %v642_v31 = vld [vmem:[#allocation9 + $0x280] sm:$0xff] }
 0x23f   :  { %795 = vmatpush.msra.mxu0 %v641_v13  ;;  %858 = vmatpush.msrb.mxu2 %v686_v34  ;;  %v658_v32 = vld [vmem:[#allocation9 + $0x300] sm:$0xff] }
 0x240   :  { %819 = vmatpush.msra.mxu1 %v653_v37  ;;  %839 = vmatpush.msra.mxu3 %v669_v38 }
 0x241   :  { %796 = vmatpush.msra.mxu0 %v640_v19  ;;  %859 = vmatpush.msrb.mxu2 %v685_v40  ;;  %v645_v19 = vld [vmem:[#allocation9 + $0x298] sm:$0xff] }
 0x242   :  { %820 = vmatpush.msra.mxu1 %v652_v42  ;;  %840 = vmatpush.msra.mxu3 %v668_v44  ;;  %v891_v44 = vld [vmem:[%s1514_s11 + $0x78] sm:$0xff] }
 0x243   :  { %797 = vmatpush.msra.mxu0 %v639_v25  ;;  %860 = vmatpush.msrb.mxu2 %v684_v45  ;;  %v676_v25 = vld [vmem:[#allocation9 + $0x390] sm:$0xff] }
 0x244   :  { %821 = vmatpush.msra.mxu1 %v651_v48  ;;  %841 = vmatpush.msra.mxu3 %v667_v49  ;;  %v890_v49 = vld [vmem:[%s1514_s11 + $0x70] sm:$0xff] }
 0x245   :  { %798 = vmatpush.msra.mxu0 %v638_v30  ;;  %861 = vmatpush.msrb.mxu2 %v683_v50  ;;  %v626_v30 = vld [vmem:[#allocation9 + $0x200] sm:$0xff]  ;;  %v889_v50 = vld [vmem:[%s1514_s11 + $0x68] sm:$0xff] }
 0x246   :  { %822 = vmatpush.msra.mxu1 %v650_v53  ;;  %842 = vmatpush.msra.mxu3 %v666_v54 }
 0x247   :  { %799 = vmatpush.msra.mxu0 %v637_v36  ;;  %862 = vmatpush.msrb.mxu2 %v682_v55 }
 0x248   :  { %823 = vmatpush.msra.mxu1 %v649_v57  ;;  %843 = vmatpush.msra.mxu3 %v665_v58  ;;  %v886_v57 = vld [vmem:[%s1514_s11 + $0x50] sm:$0xff]  ;;  %v885_v58 = vld [vmem:[%s1514_s11 + $0x48] sm:$0xff] }
 0x249   :  { %800 = vmatpush.msra.mxu0 %v636_v41  ;;  %863 = vmatpush.msrb.mxu2 %v681_v59  ;;  %v884_v59 = vld [vmem:[%s1514_s11 + $0x40] sm:$0xff] }
 0x24a   :  { %824 = vmatpush.msra.mxu1 %v648_v2  ;;  %844 = vmatpush.msra.mxu3 %v664_v4  ;;  %v877_v2 = vld [vmem:[%s1514_s11 + $0x8] sm:$0xff]  ;;  %v954_v4 = vld [vmem:[%s1513_s10] ss:$0 sm:$0xff] }
 0x24b   :  { %801 = vmatpush.msra.mxu0 %v635_v47  ;;  %864 = vmatpush.msrb.mxu2 %v680_v5 }
 0x24c   :  { %825 = vmatpush.msra.mxu1 %v647_v8  ;;  %845 = vmatpush.msra.mxu3 %v663_v10 }
 0x24d   :  { %802 = vmatpush.msra.mxu0 %v634_v52 }
 0x24f   :  { %803 = vmatpush.msra.mxu0 %v633_v56  ;;  %v887_v56 = vld [vmem:[%s1514_s11 + $0x58] sm:$0xff] }
 0x29e   :  { %v483_v1 = vpop.f32.mrf.mxu3 }
 0x29f   :  { %v484_v7 = vadd.f32 %v1428_v60, %v483_v1  ;;  %v632_v1 = vld [vmem:[#allocation9 + $0x230] sm:$0xff] }
 0x2a0   :  { %804 = vmatpush.msra.mxu0 %v632_v1  ;;  %v878_v1 = vld [vmem:[%s1514_s11 + $0x10] sm:$0xff] }
 0x2b5   :  { %v506_v11 = vpop.f32.mrf.mxu2 }
 0x2b6   :  { %v507_v15 = vadd.f32 %v506_v11, %v484_v7  ;;  %v631_v7 = vld [vmem:[#allocation9 + $0x228] sm:$0xff] }
 0x2b7   :  { %v679_v11 = vld [vmem:[#allocation9 + $0x3a8] sm:$0xff]  ;;  %805 = vmatpush.msra.mxu0 %v631_v7 }
 0x2b8   :  { %v512_v22 = vmax.f32 %v507_v15, 0.0  ;;  %v646_v15 = vld [vmem:[#allocation9 + $0x2a0] sm:$0xff]  ;;  %865 = vmatpush.msrb.mxu2 %v679_v11 }
 0x2b9   :  { %806 = vmatpush.msra.mxu0 %v630_v14  ;;  %826 = vmatpush.msra.mxu1 %v646_v15 }
 0x2ba   :  { %v518_v28 = vmul.f32 %v1434_v16, %v512_v22  ;;  %866 = vmatpush.msrb.mxu2 %v678_v17  ;;  %v628_v22 = vld [vmem:[#allocation9 + $0x210] sm:$0xff] }
 0x2bb   :  { %807 = vmatpush.msra.mxu0 %v629_v18  ;;  %827 = vmatpush.msra.mxu1 %v645_v19 }
 0x2bc   :  { %v524_v33 = vadd.f32 %v1439_v23, %v518_v28  ;;  %867 = vmatpush.msrb.mxu2 %v677_v21  ;;  %v659_v28 = vld [vmem:[#allocation9 + $0x308] sm:$0xff] }
 0x2bd   :  { %v486_v35 = vpop.f32.mrf.mxu3  ;;  %808 = vmatpush.msra.mxu0 %v628_v22  ;;  %v955_v22 = vld [vmem:[%s1515_s12] ss:$0 sm:$0xff] }
 0x2be   :  { %526 = vst [vmem:[#allocation7] sm:$0xff] %v524_v33  ;;  %v487_v39 = vadd.f32 %v1428_v60, %v486_v35  ;;  %868 = vmatpush.msrb.mxu2 %v676_v25  ;;  %v674_v33 = vld [vmem:[#allocation9 + $0x380] sm:$0xff] }
 0x2bf   :  { %v509_v43 = vpop.f32.mrf.mxu2  ;;  %809 = vmatpush.msra.mxu0 %v627_v26 }
 0x2c0   :  { %v510_v46 = vadd.f32 %v509_v43, %v487_v39  ;;  %869 = vmatpush.msrb.mxu2 %v675_v29 }
 0x2c1   :  { %810 = vmatpush.msra.mxu0 %v626_v30 }
 0x2c2   :  { %v513_v51 = vmax.f32 %v510_v46, 0.0  ;;  %870 = vmatpush.msrb.mxu2 %v674_v33 }
 0x2c4   :  { %v519_v0 = vmul.f32 %v1434_v16, %v513_v51  ;;  %v662_v16 = vld [vmem:[#allocation9 + $0x320] sm:$0xff]  ;;  %v888_v51 = vld [vmem:[%s1514_s11 + $0x60] sm:$0xff] }
 0x2c5   :  { %v528_v60 = vld [vmem:[#allocation7] sm:$0x1]  ;;  %v530_v61 = vld [vmem:[#allocation7 + $0x1] sm:$0x1]  ;;  %v532_v62 = vld [vmem:[#allocation7 + $0x2] sm:$0x1]  ;;  %846 = vmatpush.msra.mxu3 %v662_v16 }
 0x2c6   :  { %529 = vst [vmem:[#allocation8] sm:$0x1] %v528_v60  ;;  %v534_v63 = vld [vmem:[#allocation7 + $0x3] sm:$0x1]  ;;  %v536_v3 = vld [vmem:[#allocation7 + $0x4] sm:$0x1]  ;;  %v525_v13 = vadd.f32 %v1439_v23, %v519_v0 }
 0x2c7   :  { %531 = vst [vmem:[#allocation8 + $0x2] sm:$0x1] %v530_v61  ;;  %v538_v6 = vld [vmem:[#allocation7 + $0x5] sm:$0x1]  ;;  %v540_v9 = vld [vmem:[#allocation7 + $0x6] sm:$0x1]  ;;  %847 = vmatpush.msra.mxu3 %v661_v20 }
 0x2c8   :  { %533 = vst [vmem:[#allocation8 + $0x4] sm:$0x1] %v532_v62  ;;  %v542_v12 = vld [vmem:[#allocation7 + $0x7] sm:$0x1]  ;;  %v644_v23 = vld [vmem:[#allocation9 + $0x290] sm:$0xff]  ;;  %v882_v61 = vld [vmem:[%s1514_s11 + $0x30] sm:$0xff] }
 0x2c9   :  { %535 = vst [vmem:[#allocation8 + $0x6] sm:$0x1] %v534_v63  ;;  %828 = vmatpush.msra.mxu1 %v644_v23  ;;  %848 = vmatpush.msra.mxu3 %v660_v24  ;;  %v883_v60 = vld [vmem:[%s1514_s11 + $0x38] sm:$0xff]  ;;  %v881_v62 = vld [vmem:[%s1514_s11 + $0x28] sm:$0xff]  ;;  %v880_v63 = vld [vmem:[%s1514_s11 + $0x20] sm:$0xff] }
 0x2ca   :  { %537 = vst [vmem:[#allocation8 + $0x8] sm:$0x1] %v536_v3  ;;  %v879_v0 = vld [vmem:[%s1514_s11 + $0x18] sm:$0xff]  ;;  %v876_v3 = vld [vmem:[%s1514_s11] sm:$0xff] }
 0x2cb   :  { %539 = vst [vmem:[#allocation8 + $0xa] sm:$0x1] %v538_v6  ;;  %829 = vmatpush.msra.mxu1 %v643_v27  ;;  %849 = vmatpush.msra.mxu3 %v659_v28 }
 0x2cc   :  { %541 = vst [vmem:[#allocation8 + $0xc] sm:$0x1] %v540_v9 }
 0x2cd   :  { %543 = vst [vmem:[#allocation8 + $0xe] sm:$0x1] %v542_v12  ;;  %830 = vmatpush.msra.mxu1 %v642_v31  ;;  %850 = vmatpush.msra.mxu3 %v658_v32 }
 0x2ce   :  { %527 = vst [vmem:[#allocation7 + $0x8] sm:$0xff] %v525_v13 }
 0x2d5   :  { %v544_v34 = vld [vmem:[#allocation7 + $0x8] sm:$0x1]  ;;  %v546_v35 = vld [vmem:[#allocation7 + $0x9] sm:$0x1]  ;;  %v548_v36 = vld [vmem:[#allocation7 + $0xa] sm:$0x1] }
 0x2d6   :  { %545 = vst [vmem:[#allocation8 + $0x1] sm:$0x1] %v544_v34  ;;  %v550_v37 = vld [vmem:[#allocation7 + $0xb] sm:$0x1]  ;;  %v552_v38 = vld [vmem:[#allocation7 + $0xc] sm:$0x1] }
 0x2d7   :  { %547 = vst [vmem:[#allocation8 + $0x3] sm:$0x1] %v546_v35  ;;  %v554_v39 = vld [vmem:[#allocation7 + $0xd] sm:$0x1]  ;;  %v556_v40 = vld [vmem:[#allocation7 + $0xe] sm:$0x1] }
 0x2d8   :  { %549 = vst [vmem:[#allocation8 + $0x5] sm:$0x1] %v548_v36  ;;  %v558_v41 = vld [vmem:[#allocation7 + $0xf] sm:$0x1] }
 0x2d9   :  { %551 = vst [vmem:[#allocation8 + $0x7] sm:$0x1] %v550_v37 }
 0x2da   :  { %553 = vst [vmem:[#allocation8 + $0x9] sm:$0x1] %v552_v38 }
 0x2db   :  { %555 = vst [vmem:[#allocation8 + $0xb] sm:$0x1] %v554_v39 }
 0x2dc   :  { %557 = vst [vmem:[#allocation8 + $0xd] sm:$0x1] %v556_v40 }
 0x2dd   :  { %559 = vst [vmem:[#allocation8 + $0xf] sm:$0x1] %v558_v41 }
 0x2e0   :  { %v560_v42 = vld [vmem:[#allocation8] sm:$0xff] }
 0x2e1   :  { %696 = vst [vmem:[#allocation1] ss:$4 sm:$0xff] %v560_v42 }
 0x2e4   :  { %v561_v43 = vld [vmem:[#allocation8 + $0x8] sm:$0xff] }
 0x2e5   :  { %698 = vst [vmem:[#allocation1 + $0x20] ss:$4 sm:$0xff] %v561_v43 }
 0x2e8   :  { %v699_v45 = vld.sshfl [vmem:[#allocation1] sm:$0xff pattern:$0x73625140]  ;;  %v700_v46 = vld.sshfl [vmem:[#allocation1 + $0x8] sm:$0xff pattern:$0x73625140] }
 0x2e9   :  { %731 = vmatmul.f32.vlgmr.msrb.gmra.mxu0 %v699_v45  ;;  %751 = vmatmul.f32.vlgmr.msrb.gmra.mxu1 %v700_v46  ;;  %v701_v47 = vld.sshfl [vmem:[#allocation1 + $0x10] sm:$0xff pattern:$0x73625140]  ;;  %v702_v48 = vld.sshfl [vmem:[#allocation1 + $0x18] sm:$0xff pattern:$0x73625140] }
 0x2ea   :  { %771 = vmatmul.f32.vlgmr.msrb.gmra.mxu3 %v701_v47  ;;  %791 = vmatmul.f32.vlgmr.msra.gmra.mxu2 %v702_v48 }
 0x2eb   :  { %896 = vmatpush.msrb.mxu0 %v891_v44 }
 0x2ec   :  { %v703_v52 = vld.sshfl [vmem:[#allocation1 + $0x20] sm:$0xff pattern:$0x73625140]  ;;  %v704_v53 = vld.sshfl [vmem:[#allocation1 + $0x28] sm:$0xff pattern:$0x73625140] }
 0x2ed   :  { %897 = vmatpush.msrb.mxu0 %v890_v49  ;;  %v705_v54 = vld.sshfl [vmem:[#allocation1 + $0x30] sm:$0xff pattern:$0x73625140]  ;;  %v706_v55 = vld.sshfl [vmem:[#allocation1 + $0x38] sm:$0xff pattern:$0x73625140] }
 0x2ef   :  { %898 = vmatpush.msrb.mxu0 %v889_v50 }
 0x2f1   :  { %811 = vmatmul.f32.vlgmr.msra.gmra.mxu0 %v703_v52  ;;  %831 = vmatmul.f32.vlgmr.msra.gmra.mxu1 %v704_v53 }
 0x2f2   :  { %851 = vmatmul.f32.vlgmr.msra.gmra.mxu3 %v705_v54  ;;  %871 = vmatmul.f32.vlgmr.msrb.gmra.mxu2 %v706_v55 }
 0x2f3   :  { %899 = vmatpush.msrb.mxu0 %v888_v51 }
 0x2f5   :  { %900 = vmatpush.msrb.mxu0 %v887_v56 }
 0x2f7   :  { %901 = vmatpush.msrb.mxu0 %v886_v57 }
 0x2f9   :  { %902 = vmatpush.msrb.mxu0 %v885_v58 }
 0x2fb   :  { %903 = vmatpush.msrb.mxu0 %v884_v59 }
 0x2fd   :  { %904 = vmatpush.msrb.mxu0 %v883_v60 }
 0x2ff   :  { %905 = vmatpush.msrb.mxu0 %v882_v61 }
 0x301   :  { %906 = vmatpush.msrb.mxu0 %v881_v62 }
 0x303   :  { %907 = vmatpush.msrb.mxu0 %v880_v63 }
 0x305   :  { %908 = vmatpush.msrb.mxu0 %v879_v0 }
 0x307   :  { %909 = vmatpush.msrb.mxu0 %v878_v1 }
 0x309   :  { %910 = vmatpush.msrb.mxu0 %v877_v2 }
 0x30b   :  { %911 = vmatpush.msrb.mxu0 %v876_v3 }
 0x366   :  { %v732_v5 = vpop.f32.mrf.mxu0  ;;  %v752_v7 = vpop.f32.mrf.mxu1 }
 0x367   :  { %v733_v6 = vadd.f32 %v954_v4, %v732_v5 }
 0x369   :  { %v753_v8 = vadd.f32 %v752_v7, %v733_v6 }
 0x36d   :  { %v772_v9 = vpop.f32.mrf.mxu3  ;;  %v792_v10 = vpop.f32.mrf.mxu2 }
 0x36e   :  { %v773_v11 = vadd.f32 %v772_v9, %v753_v8  ;;  %v812_v13 = vpop.f32.mrf.mxu0  ;;  %v832_v15 = vpop.f32.mrf.mxu1 }
 0x370   :  { %v793_v12 = vadd.f32 %v792_v10, %v773_v11 }
 0x372   :  { %v813_v14 = vadd.f32 %v812_v13, %v793_v12 }
 0x374   :  { %v833_v16 = vadd.f32 %v832_v15, %v813_v14 }
 0x375   :  { %v852_v17 = vpop.f32.mrf.mxu3  ;;  %v872_v19 = vpop.f32.mrf.mxu2 }
 0x376   :  { %v853_v18 = vadd.f32 %v852_v17, %v833_v16 }
 0x378   :  { %v873_v20 = vadd.f32 %v872_v19, %v853_v18 }
 0x37a   :  { %v875_v21 = vmax.f32 %v873_v20, 0.0 }
 0x37c   :  { %912 = vmatmul.f32.vlgmr.msrb.gmra.mxu0 %v875_v21 }
 0x3f9   :  { %v913_v23 = vpop.f32.mrf.mxu0 }
 0x3fa   :  { %v914_v24 = vadd.f32 %v955_v22, %v913_v23 }
 0x3fc   :  { %916 = vst [vmem:[#allocation12] sm:$0x3] %v914_v24 }
 0x3fd   :  { %927 = dma.vmem_to_hbm [thread:$0]  %s923_s18, 32, %s925_s21, [#allocation11]  }
 0x3fe   :  { %1006 = dma.done.wait [#allocation11], 32  }
 0x3ff   :  { %1007 = vsyncadd [#allocation11], 4294967264 }
 0x400   :  { %932 = vsyncpa [#allocation10], 1 }
 0x401   :  { %933 = vsyncpa [#allocation11], 1 }

</bundles_post_ra>
